<compile_context>
chip_gen: v5e
topology: v5e:2x2
jax: 0.10.0
libtpu: 0.0.40
codegen_flags: <defaults>
</compile_context>

<pallas_src>
import functools

import jax
import jax.numpy as jnp
import numpy as np
from jax.experimental import pallas as pl
from jax.experimental.pallas import tpu as pltpu

_VMEM = pl.BlockSpec(memory_space=pltpu.MemorySpace.VMEM)
_HI = jax.lax.Precision.HIGHEST


# ----------------------------- fused MPNEncoder kernel -----------------------------

def _mpn_encoder_kernel(fmess_ref, bgraph_ref, fnode_ref, agraph_ref,
                        wx_ref, bz_ref, bu_ref, bh_ref,
                        wzh_ref, ur_ref, whh_ref,
                        won_ref, woh_ref, bo_ref,
                        node_out_ref, h_out_ref,
                        *, depth):
    """MPNEncoder.forward (GRU message passing, all `depth` steps, + W_o readout).

    fmess : (M, I)  message input features
    bgraph: (M, K)  int32 neighbour-message indices (0 = padding row)
    fnode : (N, F)  node input features
    agraph: (N, Ka) int32 incoming-message indices (0 = padding row)
    outputs: node_hiddens (N, H) with row 0 masked, h (M, H) with row 0 zeroed.
    """
    f32 = jnp.float32
    x = fmess_ref[...]                                   # (M, I)
    bg = bgraph_ref[...]                                 # (M, K) int32
    M = x.shape[0]
    K = bg.shape[1]
    H = wzh_ref.shape[0]

    # --- per-slot neighbour one-hots, built ONCE (bgraph is depth-invariant).
    #     Stored bf16 (exact for 0/1, half the VMEM of f32); upcast to f32 at
    #     the MXU so the gather itself stays bit-exact.  Only (M, M) slabs are
    #     ever materialized -- never an (M, K, M) tensor.
    col = jax.lax.broadcasted_iota(jnp.int32, (M, M), 1)
    onehots = []
    for k in range(K):                                   # K is small & static
        onehots.append(
            jnp.where(bg[:, k:k + 1] == col, 1.0, 0.0).astype(jnp.bfloat16))

    # --- x-side projections: one packed lane-dense (I, 3H) matmul, hoisted out
    #     of the depth loop; biases folded in exactly once.
    px = jnp.dot(x, wx_ref[...], preferred_element_type=f32)    # (M, 3H)
    xz = px[:, 0:H] + bz_ref[...]            # W_z x-part + b_z
    rx = px[:, H:2 * H] + bu_ref[...]        # W_r x      + b_u (U_r bias folded)
    xh = px[:, 2 * H:3 * H] + bh_ref[...]    # W_h x-part + b_h

    wzh = wzh_ref[...]
    ur = ur_ref[...]
    whh = whh_ref[...]

    # message row 0 is the zero-padding message: forced to 0 after every step
    msg_mask = jnp.where(
        jax.lax.broadcasted_iota(jnp.int32, (M, 1), 0) == 0, 0.0, 1.0)

    def depth_step(_, h):
        sum_h = jnp.zeros((M, H), f32)
        sum_gated = jnp.zeros((M, H), f32)
        for k in range(K):                               # unrolled neighbour slots
            h_nei_k = jnp.dot(onehots[k].astype(f32), h,
                              preferred_element_type=f32)            # gather slot k
            r_k = jax.nn.sigmoid(
                rx + jnp.dot(h_nei_k, ur, preferred_element_type=f32))
            sum_h = sum_h + h_nei_k
            sum_gated = sum_gated + r_k * h_nei_k
        z = jax.nn.sigmoid(xz + jnp.dot(sum_h, wzh, preferred_element_type=f32))
        pre_h = jnp.tanh(xh + jnp.dot(sum_gated, whh, preferred_element_type=f32))
        new_h = (1.0 - z) * sum_h + z * pre_h
        return new_h * msg_mask

    # h stays resident on-chip for the whole depth loop (never touches HBM).
    h = jax.lax.fori_loop(0, depth, depth_step, jnp.zeros((M, H), f32))
    h_out_ref[...] = h

    # --- readout: pooled (N, M) neighbour-count matrix, accumulated slot by
    #     slot (never an (N, Ka, M) tensor), then two lane-dense matmuls.
    ag = agraph_ref[...]                                 # (N, Ka) int32
    N = ag.shape[0]
    Ka = ag.shape[1]
    colm = jax.lax.broadcasted_iota(jnp.int32, (N, M), 1)
    pooled = jnp.zeros((N, M), f32)
    for k in range(Ka):
        pooled = pooled + jnp.where(ag[:, k:k + 1] == colm, 1.0, 0.0)
    nei = jnp.dot(pooled, h, preferred_element_type=f32)             # (N, H)

    pre = (jnp.dot(fnode_ref[...], won_ref[...], preferred_element_type=f32)
           + jnp.dot(nei, woh_ref[...], preferred_element_type=f32)
           + bo_ref[...])
    node_mask = jnp.where(
        jax.lax.broadcasted_iota(jnp.int32, (N, 1), 0) == 0, 0.0, 1.0)
    # Dropout in W_o is identity (eval semantics).
    node_out_ref[...] = jnp.maximum(pre, 0.0) * node_mask


def mpn_encoder_pallas(p, fnode, fmess, agraph, bgraph, depth):
    """One MPNEncoder.forward as a single fused Pallas kernel -> (node_hiddens, h)."""
    M = fmess.shape[0]
    N = fnode.shape[0]
    H = p["wzh"].shape[0]
    kernel = functools.partial(_mpn_encoder_kernel, depth=int(depth))
    node_hiddens, h = pl.pallas_call(
        kernel,
        out_shape=(jax.ShapeDtypeStruct((N, H), jnp.float32),
                   jax.ShapeDtypeStruct((M, H), jnp.float32)),
        in_specs=[_VMEM] * 14,
        out_specs=(_VMEM, _VMEM),
        compiler_params=pltpu.CompilerParams(vmem_limit_bytes=32 * 1024 * 1024),
    )(fmess, bgraph, fnode, agraph,
      p["wx"], p["bz"], p["bu"], p["bh"],
      p["wzh"], p["ur"], p["whh"],
      p["won"], p["woh"], p["bo"])
    return node_hiddens, h


# ----------------------------- pure-JAX reference encoder -----------------------------

def _ref_mpn_encoder(p, fnode, fmess, agraph, bgraph, depth):
    M = fmess.shape[0]
    H = p["wzh"].shape[0]
    wzx, wr, whx = p["wx"][:, :H], p["wx"][:, H:2 * H], p["wx"][:, 2 * H:]
    mask = jnp.ones((M, 1), jnp.float32).at[0, 0].set(0.0)
    h = jnp.zeros((M, H), jnp.float32)
    for _ in range(int(depth)):
        h_nei = h[bgraph]                                           # (M, K, H)
        sum_h = h_nei.sum(axis=1)
        z = jax.nn.sigmoid(jnp.dot(fmess, wzx, precision=_HI)
                           + jnp.dot(sum_h, p["wzh"], precision=_HI) + p["bz"])
        r = jax.nn.sigmoid(jnp.dot(fmess, wr, precision=_HI)[:, None, :]
                           + jnp.dot(h_nei, p["ur"], precision=_HI) + p["bu"])
        sum_gated = (r * h_nei).sum(axis=1)
        pre_h = jnp.tanh(jnp.dot(fmess, whx, precision=_HI)
                         + jnp.dot(sum_gated, p["whh"], precision=_HI) + p["bh"])
        h = ((1.0 - z) * sum_h + z * pre_h) * mask
    nei = h[agraph].sum(axis=1)
    node_h = jnp.maximum(jnp.dot(fnode, p["won"], precision=_HI)
                         + jnp.dot(nei, p["woh"], precision=_HI) + p["bo"], 0.0)
    nmask = jnp.ones((node_h.shape[0], 1), jnp.float32).at[0, 0].set(0.0)
    return node_h * nmask, h


# ----------------------------- HierMPNEncoder glue (shared by both paths) -----------------------------

def hier_mpn_encoder_forward(params, tree_tensors, graph_tensors,
                             depthT, depthG, encoder_fn):
    E_a, E_b = params["E_a"], params["E_b"]
    E_apos, E_pos = params["E_apos"], params["E_pos"]

    # ---- embed_graph ----
    fnode_g, fmess_g, agraph_g, bgraph_g, _ = graph_tensors
    hnode_g = E_a[fnode_g]                                          # (Ng, atom)
    hmess_g = jnp.concatenate(
        [hnode_g[fmess_g[:, 0]], E_b[fmess_g[:, 2]], E_apos[fmess_g[:, 3]]], axis=-1)
    hatom, _ = encoder_fn(params["graph"], hnode_g, hmess_g, agraph_g, bgraph_g, depthG)

    # ---- embed_inter ----
    fnode_t, fmess_t, agraph_t, bgraph_t, cgraph, scope = tree_tensors
    finput_i = params["E_i"][fnode_t[:, 1]]
    hnode_sum = hatom[cgraph].sum(axis=1)
    hnode_i = jax.nn.relu(
        jnp.dot(jnp.concatenate([finput_i, hnode_sum], axis=-1),
                params["W_i_w"], precision=_HI) + params["W_i_b"])
    hmess_i = jnp.concatenate([hnode_i[fmess_t[:, 0]], E_pos[fmess_t[:, 2]]], axis=-1)
    hinter, _ = encoder_fn(params["inter"], hnode_i, hmess_i, agraph_t, bgraph_t, depthT)

    # ---- embed_tree ----
    finput_c = params["E_c"][fnode_t[:, 0]]
    hnode_c = jax.nn.relu(
        jnp.dot(jnp.concatenate([finput_c, hinter], axis=-1),
                params["W_c_w"], precision=_HI) + params["W_c_b"])
    hmess_c = jnp.concatenate([hnode_c[fmess_t[:, 0]], E_pos[fmess_t[:, 2]]], axis=-1)
    hnode, hmess = encoder_fn(params["tree"], hnode_c, hmess_c, agraph_t, bgraph_t, depthT)

    # ---- embed_root ----
    roots = jnp.asarray([st for st, _le in scope], dtype=jnp.int32)
    fnode_r = hnode_c[roots]
    agraph_r = agraph_t[roots]
    nei_r = hmess[agraph_r].sum(axis=1)
    hroot = jnp.tanh(
        jnp.dot(jnp.concatenate([fnode_r, nei_r], axis=-1),
                params["W_root_w"], precision=_HI) + params["W_root_b"])
    return hroot, hnode, hinter, hatom


# ----------------------------- main -----------------------------

def _rand(key, shape, scale=0.1):
    return scale * jax.random.normal(key, shape, jnp.float32)


def make_encoder_params(keys, input_size, node_fdim, hidden):
    # W_z = Linear(I+H, H) split into x-part (in wx[:, :H]) and h-part (wzh)
    # W_r = Linear(I, H, bias=False) -> wx[:, H:2H]
    # U_r = Linear(H, H)             -> ur, bu
    # W_h = Linear(I+H, H) split into x-part (wx[:, 2H:]) and h-part (whh)
    # W_o = Linear(node_fdim+H, H)   -> won (node part), woh (h part), bo
    return {
        "wx":  _rand(next(keys), (input_size, 3 * hidden)),
        "bz":  _rand(next(keys), (1, hidden)),
        "bu":  _rand(next(keys), (1, hidden)),
        "bh":  _rand(next(keys), (1, hidden)),
        "wzh": _rand(next(keys), (hidden, hidden)),
        "ur":  _rand(next(keys), (hidden, hidden)),
        "whh": _rand(next(keys), (hidden, hidden)),
        "won": _rand(next(keys), (node_fdim, hidden)),
        "woh": _rand(next(keys), (hidden, hidden)),
        "bo":  _rand(next(keys), (1, hidden)),
    }


if __name__ == "__main__":
    # hyperparameters (rnn_type='GRU', dropout=0.0 -> identity)
    HIDDEN, EMBED, MAX_POS = 32, 32, 8
    ATOM_SIZE, BOND_LIST_LEN = 16, 4
    BOND_SIZE = BOND_LIST_LEN + MAX_POS            # 12
    VOCAB_C, VOCAB_I = 20, 30
    DEPTH_T, DEPTH_G = 3, 4

    # graph sizes (row 0 of every message/node table is the padding row)
    NG, MG = 10, 20            # atoms, bond messages
    NT, MT = 6, 10             # tree nodes, tree messages
    AG_NB_G, BG_NB_G = 6, 4
    AG_NB_T, BG_NB_T = 4, 3
    CLUSTER_NB = 5

    keys = iter(jax.random.split(jax.random.PRNGKey(0), 64))

    params = {
        "E_a": jnp.eye(ATOM_SIZE, dtype=jnp.float32),
        "E_b": jnp.eye(BOND_LIST_LEN, dtype=jnp.float32),
        "E_apos": jnp.eye(MAX_POS, dtype=jnp.float32),
        "E_pos": jnp.eye(MAX_POS, dtype=jnp.float32),
        "E_c": _rand(next(keys), (VOCAB_C, EMBED)),
        "E_i": _rand(next(keys), (VOCAB_I, EMBED)),
        "W_i_w": _rand(next(keys), (EMBED + HIDDEN, HIDDEN)),
        "W_i_b": _rand(next(keys), (HIDDEN,)),
        "W_c_w": _rand(next(keys), (EMBED + HIDDEN, HIDDEN)),
        "W_c_b": _rand(next(keys), (HIDDEN,)),
        "W_root_w": _rand(next(keys), (2 * HIDDEN, HIDDEN)),
        "W_root_b": _rand(next(keys), (HIDDEN,)),
        "graph": make_encoder_params(keys, ATOM_SIZE + BOND_SIZE, ATOM_SIZE, HIDDEN),
        "inter": make_encoder_params(keys, HIDDEN + MAX_POS, HIDDEN, HIDDEN),
        "tree":  make_encoder_params(keys, HIDDEN + MAX_POS, HIDDEN, HIDDEN),
    }

    # graph tensors
    fnode_g = jax.random.randint(next(keys), (NG,), 0, ATOM_SIZE, jnp.int32)
    fmess_g = jnp.stack([
        jax.random.randint(next(keys), (MG,), 0, NG, jnp.int32),
        jax.random.randint(next(keys), (MG,), 0, NG, jnp.int32),
        jax.random.randint(next(keys), (MG,), 0, BOND_LIST_LEN, jnp.int32),
        jax.random.randint(next(keys), (MG,), 0, MAX_POS, jnp.int32)], axis=1)
    agraph_g = jax.random.randint(next(keys), (NG, AG_NB_G), 0, MG, jnp.int32)
    bgraph_g = jax.random.randint(next(keys), (MG, BG_NB_G), 0, MG, jnp.int32)
    graph_tensors = (fnode_g, fmess_g, agraph_g, bgraph_g, None)

    # tree tensors
    fnode_t = jnp.stack([
        jax.random.randint(next(keys), (NT,), 0, VOCAB_C, jnp.int32),
        jax.random.randint(next(keys), (NT,), 0, VOCAB_I, jnp.int32)], axis=1)
    fmess_t = jnp.stack([
        jax.random.randint(next(keys), (MT,), 0, NT, jnp.int32),
        jax.random.randint(next(keys), (MT,), 0, NT, jnp.int32),
        jax.random.randint(next(keys), (MT,), 0, MAX_POS, jnp.int32)], axis=1)
    agraph_t = jax.random.randint(next(keys), (NT, AG_NB_T), 0, MT, jnp.int32)
    bgraph_t = jax.random.randint(next(keys), (MT, BG_NB_T), 0, MT, jnp.int32)
    cgraph = jax.random.randint(next(keys), (NT, CLUSTER_NB), 0, NG, jnp.int32)
    scope = [(1, 3), (4, 2)]                    # two molecules; roots = nodes 1, 4
    tree_tensors = (fnode_t, fmess_t, agraph_t, bgraph_t, cgraph, scope)

    # precondition for the one-hot gather: indices must lie in [0, rows)
    assert int(jnp.max(agraph_g)) < MG and int(jnp.max(bgraph_g)) < MG
    assert int(jnp.max(agraph_t)) < MT and int(jnp.max(bgraph_t)) < MT
    assert int(jnp.max(cgraph)) < NG

    out_pallas = hier_mpn_encoder_forward(params, tree_tensors, graph_tensors,
                                          DEPTH_T, DEPTH_G, mpn_encoder_pallas)
    jax.block_until_ready(out_pallas)

    out_ref = hier_mpn_encoder_forward(params, tree_tensors, graph_tensors,
                                       DEPTH_T, DEPTH_G, _ref_mpn_encoder)
    jax.block_until_ready(out_ref)

    # tolerance tightened 5e-2 -> 1e-2: the f32 gather keeps the Pallas path
    # numerically faithful; headroom only covers MXU pass-precision vs XLA.
    for name, a, b in zip(("hroot", "hnode", "hinter", "hatom"), out_pallas, out_ref):
        np.testing.assert_allclose(np.asarray(a), np.asarray(b),
                                   rtol=1e-2, atol=1e-2, err_msg=name)

    hroot, hnode, hinter, hatom = out_pallas
    assert hroot.shape == (len(scope), HIDDEN)
    assert hnode.shape == (NT, HIDDEN)
    assert hinter.shape == (NT, HIDDEN)
    assert hatom.shape == (NG, HIDDEN)

    print("KERNEL_OK")
</pallas_src>

<mosaic_0001>
module attributes {stable_mosaic.version = 11 : i64} {
  func.func @_mpn_encoder_kernel(%arg0: memref<20x28xf32, #tpu.memory_space<vmem>>, %arg1: memref<20x4xi32, #tpu.memory_space<vmem>>, %arg2: memref<10x16xf32, #tpu.memory_space<vmem>>, %arg3: memref<10x6xi32, #tpu.memory_space<vmem>>, %arg4: memref<28x96xf32, #tpu.memory_space<vmem>>, %arg5: memref<1x32xf32, #tpu.memory_space<vmem>>, %arg6: memref<1x32xf32, #tpu.memory_space<vmem>>, %arg7: memref<1x32xf32, #tpu.memory_space<vmem>>, %arg8: memref<32x32xf32, #tpu.memory_space<vmem>>, %arg9: memref<32x32xf32, #tpu.memory_space<vmem>>, %arg10: memref<32x32xf32, #tpu.memory_space<vmem>>, %arg11: memref<16x32xf32, #tpu.memory_space<vmem>>, %arg12: memref<32x32xf32, #tpu.memory_space<vmem>>, %arg13: memref<1x32xf32, #tpu.memory_space<vmem>>, %arg14: memref<10x32xf32, #tpu.memory_space<vmem>>, %arg15: memref<20x32xf32, #tpu.memory_space<vmem>>) attributes {dimension_semantics = [], scalar_prefetch = 0 : i64, scratch_operands = 0 : i64, tpu.core_type = #tpu.core_type<tc>} {
    %c0 = arith.constant 0 : index
    %c0_0 = arith.constant 0 : index
    %0 = vector.load %arg0[%c0, %c0_0] : memref<20x28xf32, #tpu.memory_space<vmem>>, vector<20x28xf32>
    %c0_1 = arith.constant 0 : index
    %c0_2 = arith.constant 0 : index
    %1 = vector.load %arg1[%c0_1, %c0_2] : memref<20x4xi32, #tpu.memory_space<vmem>>, vector<20x4xi32>
    %2 = tpu.iota {dimensions = array<i32: 1>} : vector<20x20xi32>
    %3 = vector.extract_strided_slice %1 {offsets = [0, 0], sizes = [20, 1], strides = [1, 1]} : vector<20x4xi32> to vector<20x1xi32>
    %4 = vector.broadcast %3 : vector<20x1xi32> to vector<20x20xi32>
    %5 = arith.cmpi eq, %4, %2 : vector<20x20xi32>
    %cst = arith.constant 1.000000e+00 : f32
    %cst_3 = arith.constant 0.000000e+00 : f32
    %6 = vector.broadcast %cst : f32 to vector<20x20xf32>
    %7 = vector.broadcast %cst_3 : f32 to vector<20x20xf32>
    %8 = arith.select %5, %6, %7 : vector<20x20xi1>, vector<20x20xf32>
    %9 = arith.truncf %8 : vector<20x20xf32> to vector<20x20xbf16>
    %10 = vector.extract_strided_slice %1 {offsets = [0, 1], sizes = [20, 1], strides = [1, 1]} : vector<20x4xi32> to vector<20x1xi32>
    %11 = vector.broadcast %10 : vector<20x1xi32> to vector<20x20xi32>
    %12 = arith.cmpi eq, %11, %2 : vector<20x20xi32>
    %cst_4 = arith.constant 1.000000e+00 : f32
    %cst_5 = arith.constant 0.000000e+00 : f32
    %13 = vector.broadcast %cst_4 : f32 to vector<20x20xf32>
    %14 = vector.broadcast %cst_5 : f32 to vector<20x20xf32>
    %15 = arith.select %12, %13, %14 : vector<20x20xi1>, vector<20x20xf32>
    %16 = arith.truncf %15 : vector<20x20xf32> to vector<20x20xbf16>
    %17 = vector.extract_strided_slice %1 {offsets = [0, 2], sizes = [20, 1], strides = [1, 1]} : vector<20x4xi32> to vector<20x1xi32>
    %18 = vector.broadcast %17 : vector<20x1xi32> to vector<20x20xi32>
    %19 = arith.cmpi eq, %18, %2 : vector<20x20xi32>
    %cst_6 = arith.constant 1.000000e+00 : f32
    %cst_7 = arith.constant 0.000000e+00 : f32
    %20 = vector.broadcast %cst_6 : f32 to vector<20x20xf32>
    %21 = vector.broadcast %cst_7 : f32 to vector<20x20xf32>
    %22 = arith.select %19, %20, %21 : vector<20x20xi1>, vector<20x20xf32>
    %23 = arith.truncf %22 : vector<20x20xf32> to vector<20x20xbf16>
    %24 = vector.extract_strided_slice %1 {offsets = [0, 3], sizes = [20, 1], strides = [1, 1]} : vector<20x4xi32> to vector<20x1xi32>
    %25 = vector.broadcast %24 : vector<20x1xi32> to vector<20x20xi32>
    %26 = arith.cmpi eq, %25, %2 : vector<20x20xi32>
    %cst_8 = arith.constant 1.000000e+00 : f32
    %cst_9 = arith.constant 0.000000e+00 : f32
    %27 = vector.broadcast %cst_8 : f32 to vector<20x20xf32>
    %28 = vector.broadcast %cst_9 : f32 to vector<20x20xf32>
    %29 = arith.select %26, %27, %28 : vector<20x20xi1>, vector<20x20xf32>
    %30 = arith.truncf %29 : vector<20x20xf32> to vector<20x20xbf16>
    %c0_10 = arith.constant 0 : index
    %c0_11 = arith.constant 0 : index
    %31 = vector.load %arg4[%c0_10, %c0_11] : memref<28x96xf32, #tpu.memory_space<vmem>>, vector<28x96xf32>
    %cst_12 = arith.constant dense<0.000000e+00> : vector<20x96xf32>
    %32 = tpu.matmul %0, %31, %cst_12 {dimension_numbers = #tpu.dot_dimension_numbers<[1], [0], [0], [1], [0, 0, 1, 1], [], []>} : vector<20x28xf32>, vector<28x96xf32>, vector<20x96xf32> -> vector<20x96xf32>
    %33 = vector.extract_strided_slice %32 {offsets = [0, 0], sizes = [20, 32], strides = [1, 1]} : vector<20x96xf32> to vector<20x32xf32>
    %c0_13 = arith.constant 0 : index
    %c0_14 = arith.constant 0 : index
    %34 = vector.load %arg5[%c0_13, %c0_14] : memref<1x32xf32, #tpu.memory_space<vmem>>, vector<1x32xf32>
    %35 = vector.broadcast %34 : vector<1x32xf32> to vector<20x32xf32>
    %36 = arith.addf %33, %35 : vector<20x32xf32>
    %37 = vector.extract_strided_slice %32 {offsets = [0, 32], sizes = [20, 32], strides = [1, 1]} : vector<20x96xf32> to vector<20x32xf32>
    %c0_15 = arith.constant 0 : index
    %c0_16 = arith.constant 0 : index
    %38 = vector.load %arg6[%c0_15, %c0_16] : memref<1x32xf32, #tpu.memory_space<vmem>>, vector<1x32xf32>
    %39 = vector.broadcast %38 : vector<1x32xf32> to vector<20x32xf32>
    %40 = arith.addf %37, %39 : vector<20x32xf32>
    %41 = vector.extract_strided_slice %32 {offsets = [0, 64], sizes = [20, 32], strides = [1, 1]} : vector<20x96xf32> to vector<20x32xf32>
    %c0_17 = arith.constant 0 : index
    %c0_18 = arith.constant 0 : index
    %42 = vector.load %arg7[%c0_17, %c0_18] : memref<1x32xf32, #tpu.memory_space<vmem>>, vector<1x32xf32>
    %43 = vector.broadcast %42 : vector<1x32xf32> to vector<20x32xf32>
    %44 = arith.addf %41, %43 : vector<20x32xf32>
    %c0_19 = arith.constant 0 : index
    %c0_20 = arith.constant 0 : index
    %45 = vector.load %arg8[%c0_19, %c0_20] : memref<32x32xf32, #tpu.memory_space<vmem>>, vector<32x32xf32>
    %c0_21 = arith.constant 0 : index
    %c0_22 = arith.constant 0 : index
    %46 = vector.load %arg9[%c0_21, %c0_22] : memref<32x32xf32, #tpu.memory_space<vmem>>, vector<32x32xf32>
    %c0_23 = arith.constant 0 : index
    %c0_24 = arith.constant 0 : index
    %47 = vector.load %arg10[%c0_23, %c0_24] : memref<32x32xf32, #tpu.memory_space<vmem>>, vector<32x32xf32>
    %48 = tpu.iota {dimensions = array<i32: 0>} : vector<20x1xi32>
    %c0_i32 = arith.constant 0 : i32
    %49 = vector.broadcast %c0_i32 : i32 to vector<20x1xi32>
    %50 = arith.cmpi eq, %48, %49 : vector<20x1xi32>
    %cst_25 = arith.constant 0.000000e+00 : f32
    %cst_26 = arith.constant 1.000000e+00 : f32
    %51 = vector.broadcast %cst_25 : f32 to vector<20x1xf32>
    %52 = vector.broadcast %cst_26 : f32 to vector<20x1xf32>
    %53 = arith.select %50, %51, %52 : vector<20x1xi1>, vector<20x1xf32>
    %cst_27 = arith.constant 0.000000e+00 : f32
    %54 = vector.broadcast %cst_27 : f32 to vector<20x32xf32>
    %c0_i32_28 = arith.constant 0 : i32
    %c4_i32 = arith.constant 4 : i32
    %55 = arith.addi %c0_i32_28, %c4_i32 : i32
    %c1_i32 = arith.constant 1 : i32
    %56 = scf.for %arg16 = %c0_i32_28 to %55 step %c1_i32 iter_args(%arg17 = %54) -> (vector<20x32xf32>)  : i32 {
      %cst_63 = arith.constant 0.000000e+00 : f32
      %124 = vector.broadcast %cst_63 : f32 to vector<20x32xf32>
      %cst_64 = arith.constant 0.000000e+00 : f32
      %125 = vector.broadcast %cst_64 : f32 to vector<20x32xf32>
      %126 = arith.extf %9 : vector<20x20xbf16> to vector<20x20xf32>
      %cst_65 = arith.constant dense<0.000000e+00> : vector<20x32xf32>
      %127 = tpu.matmul %126, %arg17, %cst_65 {dimension_numbers = #tpu.dot_dimension_numbers<[1], [0], [0], [1], [0, 0, 1, 1], [], []>} : vector<20x20xf32>, vector<20x32xf32>, vector<20x32xf32> -> vector<20x32xf32>
      %cst_66 = arith.constant dense<0.000000e+00> : vector<20x32xf32>
      %128 = tpu.matmul %127, %46, %cst_66 {dimension_numbers = #tpu.dot_dimension_numbers<[1], [0], [0], [1], [0, 0, 1, 1], [], []>} : vector<20x32xf32>, vector<32x32xf32>, vector<20x32xf32> -> vector<20x32xf32>
      %129 = arith.addf %40, %128 : vector<20x32xf32>
      %130 = arith.negf %129 : vector<20x32xf32>
      %131 = math.exp %130 : vector<20x32xf32>
      %cst_67 = arith.constant 1.000000e+00 : f32
      %132 = vector.broadcast %cst_67 : f32 to vector<20x32xf32>
      %133 = arith.addf %132, %131 : vector<20x32xf32>
      %134 = arith.divf %132, %133 : vector<20x32xf32>
      %135 = arith.addf %124, %127 : vector<20x32xf32>
      %136 = arith.mulf %134, %127 : vector<20x32xf32>
      %137 = arith.addf %125, %136 : vector<20x32xf32>
      %138 = arith.extf %16 : vector<20x20xbf16> to vector<20x20xf32>
      %cst_68 = arith.constant dense<0.000000e+00> : vector<20x32xf32>
      %139 = tpu.matmul %138, %arg17, %cst_68 {dimension_numbers = #tpu.dot_dimension_numbers<[1], [0], [0], [1], [0, 0, 1, 1], [], []>} : vector<20x20xf32>, vector<20x32xf32>, vector<20x32xf32> -> vector<20x32xf32>
      %cst_69 = arith.constant dense<0.000000e+00> : vector<20x32xf32>
      %140 = tpu.matmul %139, %46, %cst_69 {dimension_numbers = #tpu.dot_dimension_numbers<[1], [0], [0], [1], [0, 0, 1, 1], [], []>} : vector<20x32xf32>, vector<32x32xf32>, vector<20x32xf32> -> vector<20x32xf32>
      %141 = arith.addf %40, %140 : vector<20x32xf32>
      %142 = arith.negf %141 : vector<20x32xf32>
      %143 = math.exp %142 : vector<20x32xf32>
      %cst_70 = arith.constant 1.000000e+00 : f32
      %144 = vector.broadcast %cst_70 : f32 to vector<20x32xf32>
      %145 = arith.addf %144, %143 : vector<20x32xf32>
      %146 = arith.divf %144, %145 : vector<20x32xf32>
      %147 = arith.addf %135, %139 : vector<20x32xf32>
      %148 = arith.mulf %146, %139 : vector<20x32xf32>
      %149 = arith.addf %137, %148 : vector<20x32xf32>
      %150 = arith.extf %23 : vector<20x20xbf16> to vector<20x20xf32>
      %cst_71 = arith.constant dense<0.000000e+00> : vector<20x32xf32>
      %151 = tpu.matmul %150, %arg17, %cst_71 {dimension_numbers = #tpu.dot_dimension_numbers<[1], [0], [0], [1], [0, 0, 1, 1], [], []>} : vector<20x20xf32>, vector<20x32xf32>, vector<20x32xf32> -> vector<20x32xf32>
      %cst_72 = arith.constant dense<0.000000e+00> : vector<20x32xf32>
      %152 = tpu.matmul %151, %46, %cst_72 {dimension_numbers = #tpu.dot_dimension_numbers<[1], [0], [0], [1], [0, 0, 1, 1], [], []>} : vector<20x32xf32>, vector<32x32xf32>, vector<20x32xf32> -> vector<20x32xf32>
      %153 = arith.addf %40, %152 : vector<20x32xf32>
      %154 = arith.negf %153 : vector<20x32xf32>
      %155 = math.exp %154 : vector<20x32xf32>
      %cst_73 = arith.constant 1.000000e+00 : f32
      %156 = vector.broadcast %cst_73 : f32 to vector<20x32xf32>
      %157 = arith.addf %156, %155 : vector<20x32xf32>
      %158 = arith.divf %156, %157 : vector<20x32xf32>
      %159 = arith.addf %147, %151 : vector<20x32xf32>
      %160 = arith.mulf %158, %151 : vector<20x32xf32>
      %161 = arith.addf %149, %160 : vector<20x32xf32>
      %162 = arith.extf %30 : vector<20x20xbf16> to vector<20x20xf32>
      %cst_74 = arith.constant dense<0.000000e+00> : vector<20x32xf32>
      %163 = tpu.matmul %162, %arg17, %cst_74 {dimension_numbers = #tpu.dot_dimension_numbers<[1], [0], [0], [1], [0, 0, 1, 1], [], []>} : vector<20x20xf32>, vector<20x32xf32>, vector<20x32xf32> -> vector<20x32xf32>
      %cst_75 = arith.constant dense<0.000000e+00> : vector<20x32xf32>
      %164 = tpu.matmul %163, %46, %cst_75 {dimension_numbers = #tpu.dot_dimension_numbers<[1], [0], [0], [1], [0, 0, 1, 1], [], []>} : vector<20x32xf32>, vector<32x32xf32>, vector<20x32xf32> -> vector<20x32xf32>
      %165 = arith.addf %40, %164 : vector<20x32xf32>
      %166 = arith.negf %165 : vector<20x32xf32>
      %167 = math.exp %166 : vector<20x32xf32>
      %cst_76 = arith.constant 1.000000e+00 : f32
      %168 = vector.broadcast %cst_76 : f32 to vector<20x32xf32>
      %169 = arith.addf %168, %167 : vector<20x32xf32>
      %170 = arith.divf %168, %169 : vector<20x32xf32>
      %171 = arith.addf %159, %163 : vector<20x32xf32>
      %172 = arith.mulf %170, %163 : vector<20x32xf32>
      %173 = arith.addf %161, %172 : vector<20x32xf32>
      %cst_77 = arith.constant dense<0.000000e+00> : vector<20x32xf32>
      %174 = tpu.matmul %171, %45, %cst_77 {dimension_numbers = #tpu.dot_dimension_numbers<[1], [0], [0], [1], [0, 0, 1, 1], [], []>} : vector<20x32xf32>, vector<32x32xf32>, vector<20x32xf32> -> vector<20x32xf32>
      %175 = arith.addf %36, %174 : vector<20x32xf32>
      %176 = arith.negf %175 : vector<20x32xf32>
      %177 = math.exp %176 : vector<20x32xf32>
      %cst_78 = arith.constant 1.000000e+00 : f32
      %178 = vector.broadcast %cst_78 : f32 to vector<20x32xf32>
      %179 = arith.addf %178, %177 : vector<20x32xf32>
      %180 = arith.divf %178, %179 : vector<20x32xf32>
      %cst_79 = arith.constant dense<0.000000e+00> : vector<20x32xf32>
      %181 = tpu.matmul %173, %47, %cst_79 {dimension_numbers = #tpu.dot_dimension_numbers<[1], [0], [0], [1], [0, 0, 1, 1], [], []>} : vector<20x32xf32>, vector<32x32xf32>, vector<20x32xf32> -> vector<20x32xf32>
      %182 = arith.addf %44, %181 : vector<20x32xf32>
      %183 = math.tanh %182 : vector<20x32xf32>
      %cst_80 = arith.constant 1.000000e+00 : f32
      %184 = vector.broadcast %cst_80 : f32 to vector<20x32xf32>
      %185 = arith.subf %184, %180 : vector<20x32xf32>
      %186 = arith.mulf %185, %171 : vector<20x32xf32>
      %187 = arith.mulf %180, %183 : vector<20x32xf32>
      %188 = arith.addf %186, %187 : vector<20x32xf32>
      %189 = vector.broadcast %53 : vector<20x1xf32> to vector<20x32xf32>
      %190 = arith.mulf %188, %189 : vector<20x32xf32>
      scf.yield %190 : vector<20x32xf32>
    }
    %c0_29 = arith.constant 0 : index
    %c0_30 = arith.constant 0 : index
    %57 = vector.load %arg15[%c0_29, %c0_30] : memref<20x32xf32, #tpu.memory_space<vmem>>, vector<20x32xf32>
    tpu.vector_store %arg15[%c0_29, %c0_30], %56 {strides = array<i32>} : memref<20x32xf32, #tpu.memory_space<vmem>>, vector<20x32xf32>,
    %c0_31 = arith.constant 0 : index
    %c0_32 = arith.constant 0 : index
    %58 = vector.load %arg3[%c0_31, %c0_32] : memref<10x6xi32, #tpu.memory_space<vmem>>, vector<10x6xi32>
    %59 = tpu.iota {dimensions = array<i32: 1>} : vector<10x20xi32>
    %cst_33 = arith.constant 0.000000e+00 : f32
    %60 = vector.broadcast %cst_33 : f32 to vector<10x20xf32>
    %61 = vector.extract_strided_slice %58 {offsets = [0, 0], sizes = [10, 1], strides = [1, 1]} : vector<10x6xi32> to vector<10x1xi32>
    %62 = vector.broadcast %61 : vector<10x1xi32> to vector<10x20xi32>
    %63 = arith.cmpi eq, %62, %59 : vector<10x20xi32>
    %cst_34 = arith.constant 1.000000e+00 : f32
    %cst_35 = arith.constant 0.000000e+00 : f32
    %64 = vector.broadcast %cst_34 : f32 to vector<10x20xf32>
    %65 = vector.broadcast %cst_35 : f32 to vector<10x20xf32>
    %66 = arith.select %63, %64, %65 : vector<10x20xi1>, vector<10x20xf32>
    %67 = arith.addf %60, %66 : vector<10x20xf32>
    %68 = vector.extract_strided_slice %58 {offsets = [0, 1], sizes = [10, 1], strides = [1, 1]} : vector<10x6xi32> to vector<10x1xi32>
    %69 = vector.broadcast %68 : vector<10x1xi32> to vector<10x20xi32>
    %70 = arith.cmpi eq, %69, %59 : vector<10x20xi32>
    %cst_36 = arith.constant 1.000000e+00 : f32
    %cst_37 = arith.constant 0.000000e+00 : f32
    %71 = vector.broadcast %cst_36 : f32 to vector<10x20xf32>
    %72 = vector.broadcast %cst_37 : f32 to vector<10x20xf32>
    %73 = arith.select %70, %71, %72 : vector<10x20xi1>, vector<10x20xf32>
    %74 = arith.addf %67, %73 : vector<10x20xf32>
    %75 = vector.extract_strided_slice %58 {offsets = [0, 2], sizes = [10, 1], strides = [1, 1]} : vector<10x6xi32> to vector<10x1xi32>
    %76 = vector.broadcast %75 : vector<10x1xi32> to vector<10x20xi32>
    %77 = arith.cmpi eq, %76, %59 : vector<10x20xi32>
    %cst_38 = arith.constant 1.000000e+00 : f32
    %cst_39 = arith.constant 0.000000e+00 : f32
    %78 = vector.broadcast %cst_38 : f32 to vector<10x20xf32>
    %79 = vector.broadcast %cst_39 : f32 to vector<10x20xf32>
    %80 = arith.select %77, %78, %79 : vector<10x20xi1>, vector<10x20xf32>
    %81 = arith.addf %74, %80 : vector<10x20xf32>
    %82 = vector.extract_strided_slice %58 {offsets = [0, 3], sizes = [10, 1], strides = [1, 1]} : vector<10x6xi32> to vector<10x1xi32>
    %83 = vector.broadcast %82 : vector<10x1xi32> to vector<10x20xi32>
    %84 = arith.cmpi eq, %83, %59 : vector<10x20xi32>
    %cst_40 = arith.constant 1.000000e+00 : f32
    %cst_41 = arith.constant 0.000000e+00 : f32
    %85 = vector.broadcast %cst_40 : f32 to vector<10x20xf32>
    %86 = vector.broadcast %cst_41 : f32 to vector<10x20xf32>
    %87 = arith.select %84, %85, %86 : vector<10x20xi1>, vector<10x20xf32>
    %88 = arith.addf %81, %87 : vector<10x20xf32>
    %89 = vector.extract_strided_slice %58 {offsets = [0, 4], sizes = [10, 1], strides = [1, 1]} : vector<10x6xi32> to vector<10x1xi32>
    %90 = vector.broadcast %89 : vector<10x1xi32> to vector<10x20xi32>
    %91 = arith.cmpi eq, %90, %59 : vector<10x20xi32>
    %cst_42 = arith.constant 1.000000e+00 : f32
    %cst_43 = arith.constant 0.000000e+00 : f32
    %92 = vector.broadcast %cst_42 : f32 to vector<10x20xf32>
    %93 = vector.broadcast %cst_43 : f32 to vector<10x20xf32>
    %94 = arith.select %91, %92, %93 : vector<10x20xi1>, vector<10x20xf32>
    %95 = arith.addf %88, %94 : vector<10x20xf32>
    %96 = vector.extract_strided_slice %58 {offsets = [0, 5], sizes = [10, 1], strides = [1, 1]} : vector<10x6xi32> to vector<10x1xi32>
    %97 = vector.broadcast %96 : vector<10x1xi32> to vector<10x20xi32>
    %98 = arith.cmpi eq, %97, %59 : vector<10x20xi32>
    %cst_44 = arith.constant 1.000000e+00 : f32
    %cst_45 = arith.constant 0.000000e+00 : f32
    %99 = vector.broadcast %cst_44 : f32 to vector<10x20xf32>
    %100 = vector.broadcast %cst_45 : f32 to vector<10x20xf32>
    %101 = arith.select %98, %99, %100 : vector<10x20xi1>, vector<10x20xf32>
    %102 = arith.addf %95, %101 : vector<10x20xf32>
    %cst_46 = arith.constant dense<0.000000e+00> : vector<10x32xf32>
    %103 = tpu.matmul %102, %56, %cst_46 {dimension_numbers = #tpu.dot_dimension_numbers<[1], [0], [0], [1], [0, 0, 1, 1], [], []>} : vector<10x20xf32>, vector<20x32xf32>, vector<10x32xf32> -> vector<10x32xf32>
    %c0_47 = arith.constant 0 : index
    %c0_48 = arith.constant 0 : index
    %104 = vector.load %arg2[%c0_47, %c0_48] : memref<10x16xf32, #tpu.memory_space<vmem>>, vector<10x16xf32>
    %c0_49 = arith.constant 0 : index
    %c0_50 = arith.constant 0 : index
    %105 = vector.load %arg11[%c0_49, %c0_50] : memref<16x32xf32, #tpu.memory_space<vmem>>, vector<16x32xf32>
    %cst_51 = arith.constant dense<0.000000e+00> : vector<10x32xf32>
    %106 = tpu.matmul %104, %105, %cst_51 {dimension_numbers = #tpu.dot_dimension_numbers<[1], [0], [0], [1], [0, 0, 1, 1], [], []>} : vector<10x16xf32>, vector<16x32xf32>, vector<10x32xf32> -> vector<10x32xf32>
    %c0_52 = arith.constant 0 : index
    %c0_53 = arith.constant 0 : index
    %107 = vector.load %arg12[%c0_52, %c0_53] : memref<32x32xf32, #tpu.memory_space<vmem>>, vector<32x32xf32>
    %cst_54 = arith.constant dense<0.000000e+00> : vector<10x32xf32>
    %108 = tpu.matmul %103, %107, %cst_54 {dimension_numbers = #tpu.dot_dimension_numbers<[1], [0], [0], [1], [0, 0, 1, 1], [], []>} : vector<10x32xf32>, vector<32x32xf32>, vector<10x32xf32> -> vector<10x32xf32>
    %109 = arith.addf %106, %108 : vector<10x32xf32>
    %c0_55 = arith.constant 0 : index
    %c0_56 = arith.constant 0 : index
    %110 = vector.load %arg13[%c0_55, %c0_56] : memref<1x32xf32, #tpu.memory_space<vmem>>, vector<1x32xf32>
    %111 = vector.broadcast %110 : vector<1x32xf32> to vector<10x32xf32>
    %112 = arith.addf %109, %111 : vector<10x32xf32>
    %113 = tpu.iota {dimensions = array<i32: 0>} : vector<10x1xi32>
    %c0_i32_57 = arith.constant 0 : i32
    %114 = vector.broadcast %c0_i32_57 : i32 to vector<10x1xi32>
    %115 = arith.cmpi eq, %113, %114 : vector<10x1xi32>
    %cst_58 = arith.constant 0.000000e+00 : f32
    %cst_59 = arith.constant 1.000000e+00 : f32
    %116 = vector.broadcast %cst_58 : f32 to vector<10x1xf32>
    %117 = vector.broadcast %cst_59 : f32 to vector<10x1xf32>
    %118 = arith.select %115, %116, %117 : vector<10x1xi1>, vector<10x1xf32>
    %cst_60 = arith.constant 0.000000e+00 : f32
    %119 = vector.broadcast %cst_60 : f32 to vector<10x32xf32>
    %120 = arith.maximumf %112, %119 : vector<10x32xf32>
    %121 = vector.broadcast %118 : vector<10x1xf32> to vector<10x32xf32>
    %122 = arith.mulf %120, %121 : vector<10x32xf32>
    %c0_61 = arith.constant 0 : index
    %c0_62 = arith.constant 0 : index
    %123 = vector.load %arg14[%c0_61, %c0_62] : memref<10x32xf32, #tpu.memory_space<vmem>>, vector<10x32xf32>
    tpu.vector_store %arg14[%c0_61, %c0_62], %122 {strides = array<i32>} : memref<10x32xf32, #tpu.memory_space<vmem>>, vector<10x32xf32>,
    return
  }
}

</mosaic_0001>

<bundles_post_ra>
// kernel: tpu_custom_call.1
= control target key start
LH: loop header
LB: loop body
LE: loop exit
PB: predicated region body
PF: predicated region fallthrough
CT: control target
= control target key end

     0   :  { %21 = vsyncpa [#allocation3], 0  ;;  %s2677_s0 = inlined_call_operand.hbm [shape: f32[20,28], index: 0, kind: input, shape index: {}]   ;;  %s2678_s1 = inlined_call_operand.vmem [shape: s32[20,4], index: 1, kind: input, shape index: {}]   ;;  %s2679_s2 = inlined_call_operand.vmem [shape: f32[10,16], index: 2, kind: input, shape index: {}]   ;;  %s2680_s3 = inlined_call_operand.vmem [shape: s32[10,6], index: 3, kind: input, shape index: {}]   ;;  %s2681_s4 = inlined_call_operand.vmem [shape: f32[28,96], index: 4, kind: input, shape index: {}]   ;;  %s2682_s5 = inlined_call_operand.vmem [shape: f32[1,32], index: 5, kind: input, shape index: {}]   ;;  %s2683_s6 = inlined_call_operand.vmem [shape: f32[1,32], index: 6, kind: input, shape index: {}]   ;;  %s2684_s7 = inlined_call_operand.vmem [shape: f32[1,32], index: 7, kind: input, shape index: {}]   ;;  %s2685_s8 = inlined_call_operand.hbm [shape: f32[32,32], index: 8, kind: input, shape index: {}]   ;;  %s2686_s9 = inlined_call_operand.hbm [shape: f32[32,32], index: 9, kind: input, shape index: {}]   ;;  %s2687_s10 = inlined_call_operand.hbm [shape: f32[32,32], index: 10, kind: input, shape index: {}]   ;;  %s2688_s11 = inlined_call_operand.hbm [shape: f32[16,32], index: 11, kind: input, shape index: {}]   ;;  %s2689_s12 = inlined_call_operand.hbm [shape: f32[32,32], index: 12, kind: input, shape index: {}]   ;;  %s2690_s13 = inlined_call_operand.vmem [shape: f32[1,32], index: 13, kind: input, shape index: {}]   ;;  %s2691_s14 = inlined_call_operand.hbm [shape: f32[10,32], index: 14, kind: output, shape index: {0}]   ;;  %s2692_s15 = inlined_call_operand.hbm [shape: f32[20,32], index: 15, kind: output, shape index: {1}]  }
   0x1   :  { %22 = vsyncpa [#allocation6], 0 }
   0x2   :  { %23 = vsyncpa [#allocation9], 0 }
   0x3   :  { %24 = vsyncpa [#allocation12], 0 }
   0x4   :  { %25 = vsyncpa [#allocation4], 0 }
   0x5   :  { %26 = vsyncpa [#allocation15], 0  ;;  %s58_s20 = sshll.u32 %s2685_s8, 4  ;;  %s1867_s21 = smov [#allocation5]   ;;  %s59_s20 = int_to_ptr.hbm [resolvable:$true] %s58_s20 }
   0x6   :  { %s60_s22 = sshll.u32 %s1867_s21, 4  ;;  %s84_s25 = sshll.u32 %s2687_s10, 4  ;;  %s61_s22 = int_to_ptr.vmem [resolvable:$true] %s60_s22  ;;  %s85_s25 = int_to_ptr.hbm [resolvable:$true] %s84_s25 }
   0x7   :  { %s1868_s26 = smov 128   ;;  %s1869_s27 = smov 8  }
   0x8   :  { %66 = dma.hbm_to_vmem [thread:$0]  %s59_s20, 512, %s61_s22, [#allocation6], %s1868_s26, %s1868_s26, %s1869_s27  }
   0x9   :  { %s1870_s28 = smov [#allocation8]   ;;  %s31_s8 = sshll.u32 %s2677_s0, 4  ;;  %s32_s8 = int_to_ptr.hbm [resolvable:$true] %s31_s8 }
   0xa   :  { %s86_s29 = sshll.u32 %s1870_s28, 4  ;;  %s71_s18 = sshll.u32 %s2686_s9, 4  ;;  %s87_s29 = int_to_ptr.vmem [resolvable:$true] %s86_s29  ;;  %s72_s18 = int_to_ptr.hbm [resolvable:$true] %s71_s18 }
   0xb   :  { %92 = dma.hbm_to_vmem [thread:$0]  %s85_s25, 512, %s87_s29, [#allocation9], %s1868_s26, %s1868_s26, %s1869_s27  }
   0xc   :  { %s1871_s19 = smov [#allocation2]   ;;  %s1872_s20 = smov [#allocation7]  }
   0xd   :  { %s33_s21 = sshll.u32 %s1871_s19, 4  ;;  %s73_s0 = sshll.u32 %s1872_s20, 4  ;;  %s34_s21 = int_to_ptr.vmem [resolvable:$true] %s33_s21  ;;  %s74_s0 = int_to_ptr.vmem [resolvable:$true] %s73_s0 }
   0xe   :  { %39 = dma.hbm_to_vmem [thread:$0]  %s32_s8, 384, %s34_s21, [#allocation3], %s1868_s26, %s1868_s26, %s1869_s27  }
   0xf   :  { %s97_s24 = sshll.u32 %s2688_s11, 4  ;;  %s110_s28 = sshll.u32 %s2689_s12, 4  ;;  %s98_s24 = int_to_ptr.hbm [resolvable:$true] %s97_s24  ;;  %s111_s28 = int_to_ptr.hbm [resolvable:$true] %s110_s28 }
  0x10   :  { %79 = dma.hbm_to_vmem [thread:$0]  %s72_s18, 512, %s74_s0, [#allocation6], %s1868_s26, %s1868_s26, %s1869_s27  }
  0x11   :  { %s1873_s29 = smov [#allocation10]   ;;  %s1874_s16 = smov [#allocation11]  }
  0x12   :  { %s99_s30 = sshll.u32 %s1873_s29, 4  ;;  %s112_s11 = sshll.u32 %s1874_s16, 4  ;;  %s100_s30 = int_to_ptr.vmem [resolvable:$true] %s99_s30  ;;  %s113_s11 = int_to_ptr.vmem [resolvable:$true] %s112_s11 }
  0x13   :  { %105 = dma.hbm_to_vmem [thread:$0]  %s98_s24, 256, %s100_s30, [#allocation9], %s1868_s26, %s1868_s26, %s1869_s27  }
  0x14   :  { %118 = dma.hbm_to_vmem [thread:$0]  %s111_s28, 512, %s113_s11, [#allocation12], %s1868_s26, %s1868_s26, %s1869_s27  }
  0x15   :  { %1839 = dma.done.wait [#allocation3], 384  }
  0x16   :  { %1840 = vsyncadd [#allocation3], 4294966912 }
  0x17   :  { %1841 = dma.done.wait [#allocation6], 1024  }
  0x18   :  { %1842 = vsyncadd [#allocation6], 4294966272 }
  0x19   :  { %1843 = dma.done.wait [#allocation9], 768  }
  0x1a   :  { %1844 = vsyncadd [#allocation9], 4294966528 }
  0x1b   :  { %1845 = dma.done.wait [#allocation12], 512  }
  0x1c   :  { %1846 = vsyncadd [#allocation12], 4294966784  ;;  %v2699_v0 = vmov 0   ;;  %v2695_v1 = vmov 1   ;;  %v2009_v2 = vld [vmem:[#allocation5] sm:$0xff]  ;;  %v2011_v3 = vld [vmem:[#allocation5 + $0x8] sm:$0xff]  ;;  %v151_v21 = vlaneseq }
  0x1d   :  { %1539 = vset.pattern.permute.xlu1 %v2699_v0  ;;  %1538 = vset.pattern.permute.xlu0 %v2699_v0  ;;  %2707 = vst [vmem:[#allocation22_spill] sm:$0xff] %v2009_v2  ;;  %v2013_v4 = vld [vmem:[#allocation5 + $0x10] sm:$0xff]  ;;  %v2015_v5 = vld [vmem:[#allocation5 + $0x18] sm:$0xff]  ;;  %v2017_v6 = vld [vmem:[#allocation7] sm:$0xff]  ;;  %vm235_vm0 = vcmask 1043456   ;;  %vm225_vm1 = vcmask 228352  }
  0x1e   :  { %1541 = vset.pattern.permute.xlu2 %v2695_v1  ;;  %2708 = vst [vmem:[#allocation23_spill] sm:$0xff] %v2011_v3  ;;  %v2019_v7 = vld [vmem:[#allocation7 + $0x8] sm:$0xff]  ;;  %v2021_v8 = vld [vmem:[#allocation7 + $0x10] sm:$0xff]  ;;  %v2023_v9 = vld [vmem:[#allocation7 + $0x18] sm:$0xff]  ;;  %v303_v24 = vshrl.u32 %v151_v21, 7  ;;  %v1877_v26 = vmov 1.0  }
  0x1f   :  { %2709 = vst [vmem:[#allocation24_spill] sm:$0xff] %v2013_v4  ;;  %v2025_v10 = vld [vmem:[#allocation8] sm:$0xff]  ;;  %v2027_v11 = vld [vmem:[#allocation8 + $0x8] sm:$0xff]  ;;  %v2029_v12 = vld [vmem:[#allocation8 + $0x10] sm:$0xff]  ;;  %v2701_v28 = vmov 2   ;;  %v2697_v29 = vmov 3  }
  0x20   :  { %2710 = vst [vmem:[#allocation25_spill] sm:$0xff] %v2015_v5  ;;  %v2031_v13 = vld [vmem:[#allocation8 + $0x18] sm:$0xff]  ;;  %v148_v15 = vld [vmem:[%s2678_s1] sm:$0xff]  ;;  %v224_v16 = vld [vmem:[%s2681_s4 + $0x18] sm:$0xf]  ;;  %vm306_vm2 = vcmp.eq.s32.totalorder %v303_v24, 0 }
  0x21   :  { %2711 = vst [vmem:[#allocation26_spill] sm:$0xff] %v2017_v6  ;;  %v150_v14 = vld [vmem:[%s2678_s1 + $0x10] sm:$0xf]  ;;  %154 = vperm.xlu0 %1538, %v148_v15   ;;  %v149_v18 = vld [vmem:[%s2678_s1 + $0x8] sm:$0xff]  ;;  %1466 = vmatpush.msk.msra.mxu2 %vm235_vm0, %v224_v16  ;;  %v221_v20 = vld [vmem:[%s2681_s4] sm:$0xff]  ;;  %v2060_v27 = vsel %vm306_vm2, 0.0, %v1877_v26 }
  0x22   :  { %2712 = vst [vmem:[#allocation27_spill] sm:$0xff] %v2019_v7  ;;  %160 = vperm.xlu1 %1539, %v150_v14   ;;  %v223_v17 = vld [vmem:[%s2681_s4 + $0x10] sm:$0xff]  ;;  %1405 = vmatpush.msk.msra.mxu0 %vm235_vm0, %v224_v16  ;;  %v222_v19 = vld [vmem:[%s2681_s4 + $0x8] sm:$0xff]  ;;  %v145_v23 = vld [vmem:[#allocation2] sm:$0xff]  ;;  %s1880_s30 = smov 32   ;;  %s1881_s16 = smov 64  }
  0x23   :  { %2713 = vst [vmem:[#allocation28_spill] sm:$0xff] %v2021_v8  ;;  %1465 = vmatpush.msk.msra.mxu1 %vm235_vm0, %v224_v16  ;;  %174 = vperm.xlu2 %1541, %v149_v18   ;;  %v147_v22 = vld [vmem:[#allocation2 + $0x10] sm:$0xf]  ;;  %v146_v25 = vld [vmem:[#allocation2 + $0x8] sm:$0xff]  ;;  %v1548_v30 = vld [vmem:[%s2683_s6] ss:$0 sm:$0xff] }
  0x24   :  { %2714 = vst [vmem:[#allocation29_spill] sm:$0xff] %v2023_v9  ;;  %1468 = vmatpush.msra.mxu2 %v223_v17  ;;  %252 = vmatpush.msra.mxu0 %v223_v17  ;;  %v1549_v31 = vld [vmem:[%s2684_s7] ss:$0 sm:$0xff]  ;;  %v2075_v32 = vand.u32 127, %v151_v21  ;;  %v2693_v34 = vmov 0.0   ;;  %v2148_v24 = vmov 0.0  }
  0x25   :  { %2715 = vst [vmem:[#allocation30_spill] sm:$0xff] %v2025_v10  ;;  %1467 = vmatpush.msra.mxu1 %v223_v17  ;;  %v1550_v52 = vld [vmem:[%s2682_s5] ss:$0 sm:$0xff]  ;;  %s2152_s5 = smov 0  }
  0x26   :  { %2716 = vst [vmem:[#allocation31_spill] sm:$0xff] %v2027_v11  ;;  %1470 = vmatpush.msra.mxu2 %v222_v19  ;;  %253 = vmatpush.msra.mxu0 %v222_v19 }
  0x27   :  { %2717 = vst [vmem:[#allocation32_spill] sm:$0xff] %v2029_v12  ;;  %1469 = vmatpush.msra.mxu1 %v222_v19 }
  0x28   :  { %2718 = vst [vmem:[#allocation33_spill] sm:$0xff] %v2031_v13  ;;  %1472 = vmatpush.msra.mxu2 %v221_v20  ;;  %254 = vmatpush.msra.mxu0 %v221_v20 }
  0x29   :  { %157 = vperm.xlu0 %1538, %v149_v18   ;;  %1408 = vmatmul.msk.f32.vlgmr.msra.gmra.mxu2 %vm225_vm1, %v147_v22 }
  0x2a   :  { %1540 = vset.pattern.permute.xlu1 %v2695_v1  ;;  %1471 = vmatpush.msra.mxu1 %v221_v20 }
  0x2b   :  { %171 = vperm.xlu1 %1540, %v148_v15   ;;  %1406 = vmatmul.msk.f32.vlgmr.msra.gmra.mxu0 %vm225_vm1, %v145_v23  ;;  %v2146_v23 = vmov 0.0  }
  0x2c   :  { %1407 = vmatmul.msk.f32.vlgmr.msra.gmra.mxu1 %vm225_vm1, %v146_v25  ;;  %177 = vperm.xlu2 %1541, %v150_v14   ;;  %v2150_v25 = vmov 0.0  }
  0x31   :  { %1542 = vset.pattern.permute.xlu0 %v2701_v28 }
  0x32   :  { %188 = vperm.xlu0 %1542, %v148_v15  }
  0x33   :  { %1543 = vset.pattern.permute.xlu1 %v2701_v28 }
  0x34   :  { %191 = vperm.xlu1 %1543, %v149_v18   ;;  %1544 = vset.pattern.permute.xlu2 %v2701_v28 }
  0x35   :  { %194 = vperm.xlu2 %1544, %v150_v14  }
  0x3a   :  { %1547 = vset.pattern.permute.xlu0 %v2697_v29 }
  0x3b   :  { %211 = vperm.xlu0 %1547, %v150_v14  }
  0x3c   :  { %1545 = vset.pattern.permute.xlu1 %v2697_v29 }
  0x3d   :  { %205 = vperm.xlu1 %1545, %v148_v15   ;;  %1546 = vset.pattern.permute.xlu2 %v2697_v29 }
  0x3e   :  { %208 = vperm.xlu2 %1546, %v149_v18  }
  0x45   :  { %275 = vrot.lane.b32.xlu1 %v1548_v30, %s1880_s30 }
  0x46   :  { %284 = vrot.lane.b32.xlu2 %v1549_v31, %s1881_s16 }
  0x7d   :  { %v175_v33 = vpop.permute.xlu2 %174 }
  0x7e   :  { %vm180_vm3 = vcmp.eq.s32.totalorder %v175_v33, %v2075_v32 }
  0x7f   :  { %v2079_v35 = vsel %vm180_vm3, 1.0, %v2693_v34 }
  0x86   :  { %v178_v36 = vpop.permute.xlu2 %177 }
  0x87   :  { %vm181_vm4 = vcmp.eq.s32.totalorder %v178_v36, %v2075_v32 }
  0x88   :  { %v2083_v37 = vsel %vm181_vm4, 1.0, %v2693_v34 }
  0x8f   :  { %v195_v38 = vpop.permute.xlu2 %194 }
  0x90   :  { %vm198_vm5 = vcmp.eq.s32.totalorder %v195_v38, %v2075_v32 }
  0x91   :  { %v2087_v39 = vsel %vm198_vm5, 1.0, %v2693_v34 }
  0x93   :  { %v155_v41 = vpop.permute.xlu0 %154 }
  0x94   :  { %v161_v40 = vpop.permute.xlu1 %160  ;;  %vm162_vm7 = vcmp.eq.s32.totalorder %v155_v41, %v2075_v32 }
  0x95   :  { %vm164_vm6 = vcmp.eq.s32.totalorder %v161_v40, %v2075_v32  ;;  %v2095_v43 = vsel %vm162_vm7, 1.0, %v2693_v34 }
  0x96   :  { %v2092_v42 = vsel %vm164_vm6, 1.0, %v2693_v34 }
  0x98   :  { %v209_v44 = vpop.permute.xlu2 %208 }
  0x99   :  { %vm214_vm8 = vcmp.eq.s32.totalorder %v209_v44, %v2075_v32 }
  0x9a   :  { %v2099_v45 = vsel %vm214_vm8, 1.0, %v2693_v34 }
  0x9b   :  { %v158_v46 = vpop.permute.xlu0 %157 }
  0x9c   :  { %vm163_vm9 = vcmp.eq.s32.totalorder %v158_v46, %v2075_v32 }
  0x9d   :  { %v172_v47 = vpop.permute.xlu1 %171  ;;  %v2103_v48 = vsel %vm163_vm9, 1.0, %v2693_v34 }
  0x9e   :  { %vm179_vm10 = vcmp.eq.s32.totalorder %v172_v47, %v2075_v32 }
  0x9f   :  { %v2107_v49 = vsel %vm179_vm10, 1.0, %v2693_v34 }
  0xa0   :  { %v285_v54 = vpop.permute.xlu2 %284 }
  0xa4   :  { %v189_v50 = vpop.permute.xlu0 %188 }
  0xa5   :  { %vm196_vm11 = vcmp.eq.s32.totalorder %v189_v50, %v2075_v32 }
  0xa6   :  { %v192_v51 = vpop.permute.xlu1 %191  ;;  %v2115_v53 = vsel %vm196_vm11, 1.0, %v2693_v34 }
  0xa7   :  { %vm197_vm12 = vcmp.eq.s32.totalorder %v192_v51, %v2075_v32 }
  0xa8   :  { %v2118_v55 = vsel %vm197_vm12, 1.0, %v2693_v34  ;;  %v256_v56 = vpop.f32.mrf.mxu0 }
  0xa9   :  { %v2120_v57 = vadd.f32 %v1550_v52, %v256_v56  ;;  %v2122_v58 = vadd.f32 %v285_v54, %v256_v56  ;;  %v259_v59 = vpop.f32.mrf.mxu1 }
  0xaa   :  { %v2124_v60 = vadd.f32 %v1550_v52, %v259_v59  ;;  %v2126_v61 = vadd.f32 %v285_v54, %v259_v59 }
  0xac   :  { %v262_v63 = vpop.f32.mrf.mxu2 }
  0xad   :  { %v212_v62 = vpop.permute.xlu0 %211  ;;  %v2129_v15 = vadd.f32 %v1550_v52, %v262_v63  ;;  %v2131_v16 = vadd.f32 %v285_v54, %v262_v63 }
  0xae   :  { %vm215_vm13 = vcmp.eq.s32.totalorder %v212_v62, %v2075_v32 }
  0xaf   :  { %v206_v14 = vpop.permute.xlu1 %205  ;;  %v2135_v17 = vsel %vm215_vm13, 1.0, %v2693_v34 }
  0xb0   :  { %vm213_vm14 = vcmp.eq.s32.totalorder %v206_v14, %v2075_v32  ;;  %2719 = vst [vmem:[#allocation34_spill] sm:$0xff] %v2135_v17 }
  0xb1   :  { %v2138_v18 = vsel %vm213_vm14, 1.0, %v2693_v34 }
  0xb2   :  { %2720 = vst [vmem:[#allocation35_spill] sm:$0xff] %v2138_v18 }
  0xb7   :  { %v276_v19 = vpop.permute.xlu1 %275 }
  0xb8   :  { %v2140_v20 = vadd.f32 %v276_v19, %v256_v56  ;;  %v2142_v21 = vadd.f32 %v276_v19, %v259_v59  ;;  %v2144_v22 = vadd.f32 %v276_v19, %v262_v63 }
  0xb9 LB: > { %v2721_v9 = vld [vmem:[#allocation29_spill] sm:$0xff]  ;;  %v2722_v8 = vld [vmem:[#allocation28_spill] sm:$0xff]  ;;  %v2723_v7 = vld [vmem:[#allocation27_spill] sm:$0xff]  ;;  %1409 = vmatpush.msk.msra.mxu0 %vm235_vm0, %v1853_v23  ;;  %1419 = vmatpush.msk.msra.mxu2 %vm235_vm0, %v1853_v23  ;;  %vm324_vm15 = vcmask 162816   ;;  %vm363_vm1 = vcmask 261120   ;;  %s1883_s11 = smov 32   ;;  %s1865_s5 = sphi %s2152_s5, %s317_s5   ;;  %v1861_v25 = vphi %v2150_v25, %v2768_v25   ;;  %v1857_v24 = vphi %v2148_v24, %v2767_v24   ;;  %v1853_v23 = vphi %v2146_v23, %v2766_v23  }
  0xba   : > { %v2724_v6 = vld [vmem:[#allocation26_spill] sm:$0xff]  ;;  %1476 = vmatpush.msk.msra.mxu3 %vm235_vm0, %v1853_v23  ;;  %1473 = vmatpush.msk.msra.mxu1 %vm235_vm0, %v1853_v23  ;;  %v2725_v5 = vld [vmem:[#allocation25_spill] sm:$0xff]  ;;  %v2726_v4 = vld [vmem:[#allocation24_spill] sm:$0xff]  ;;  %s1884_s12 = smov 96   ;;  %s1885_s8 = smov 64  }
  0xbb   : > { %351 = vmatpush.msra.mxu0 %v1857_v24  ;;  %515 = vmatpush.msra.mxu2 %v1857_v24  ;;  %v2727_v13 = vld [vmem:[#allocation33_spill] sm:$0xff]  ;;  %v2728_v3 = vld [vmem:[#allocation23_spill] sm:$0xff]  ;;  %v2729_v2 = vld [vmem:[#allocation22_spill] sm:$0xff]  ;;  %s317_s5 = sadd.s32 1, %s1865_s5  }
  0xbc   : > { %1477 = vmatpush.msra.mxu3 %v1857_v24  ;;  %1474 = vmatpush.msra.mxu1 %v1857_v24  ;;  %v2730_v12 = vld [vmem:[#allocation32_spill] sm:$0xff]  ;;  %v2731_v11 = vld [vmem:[#allocation31_spill] sm:$0xff]  ;;  %v2732_v10 = vld [vmem:[#allocation30_spill] sm:$0xff]  ;;  %p314_p0 = scmp.ge.s32.totalorder %s317_s5, 4  }
  0xbd   : > { %352 = vmatpush.msra.mxu0 %v1861_v25  ;;  %516 = vmatpush.msra.mxu2 %v1861_v25  ;;  %v2733_v18 = vld [vmem:[#allocation35_spill] sm:$0xff]  ;;  %v2734_v17 = vld [vmem:[#allocation34_spill] sm:$0xff]  ;;  %s1888_s22 = smov (%p314_p0), [#allocation14]   ;;  %s1370_s25 = sshll.u32 (%p314_p0), %s2692_s15, 4  ;;  %s1371_s25 = int_to_ptr.hbm [resolvable:$true] %s1370_s25 }
  0xbe   : > { %1410 = vmatmul.msk.f32.vlgmr.msra.gmra.mxu0 %vm324_vm15, %v2095_v43  ;;  %1420 = vmatmul.msk.f32.vlgmr.msra.gmra.mxu2 %vm324_vm15, %v2107_v49  ;;  %s1368_s23 = sshll.u32 (%p314_p0), %s1888_s22, 4  ;;  %s1357_s29 = sshll.u32 (%p314_p0), %s2691_s14, 4  ;;  %s1369_s23 = int_to_ptr.vmem [resolvable:$true] %s1368_s23  ;;  %s1358_s29 = int_to_ptr.hbm [resolvable:$true] %s1357_s29 }
  0xbf   : > { %1478 = vmatpush.msra.mxu3 %v1861_v25  ;;  %1429 = vmatpush.msk.msrb.mxu0 %vm235_vm0, %v1853_v23 }
  0xc0   : > { %1421 = vmatmul.msk.f32.vlgmr.msra.gmra.mxu3 %vm324_vm15, %v2079_v35  ;;  %1475 = vmatpush.msra.mxu1 %v1861_v25  ;;  %v2771_v35 = vmov (%p314_p0), 3  }
  0xc1   : > { %678 = vmatpush.msrb.mxu0 %v1857_v24  ;;  %1411 = vmatmul.msk.f32.vlgmr.msra.gmra.mxu1 %vm324_vm15, %v2103_v48 }
  0xc2   : > { %385 = vmatpush.msrb.mxu1 %v2721_v9  ;;  %548 = vmatpush.msrb.mxu3 %v2721_v9 }
  0xc3   : > { %679 = vmatpush.msrb.mxu0 %v1861_v25  ;;  %711 = vmatpush.msrb.mxu2 %v2721_v9 }
  0xc4   : > { %386 = vmatpush.msrb.mxu1 %v2722_v8  ;;  %549 = vmatpush.msrb.mxu3 %v2722_v8 }
  0xc5   : > { %712 = vmatpush.msrb.mxu2 %v2722_v8  ;;  %999 = vmatpush.msra.mxu0 %v2725_v5 }
  0xc6   : > { %1430 = vmatmul.msk.f32.vlgmr.msrb.gmra.mxu0 %vm324_vm15, %v2115_v53  ;;  %387 = vmatpush.msrb.mxu1 %v2723_v7  ;;  %v2773_v53 = vmov (%p314_p0), 0.0  }
  0xc7   : > { %550 = vmatpush.msrb.mxu3 %v2723_v7  ;;  %713 = vmatpush.msrb.mxu2 %v2723_v7 }
  0xc8   : > { %1422 = vmatmul.msk.f32.gmra.mxu3 %vm324_vm15, %v2083_v37  ;;  %388 = vmatpush.msrb.mxu1 %v2724_v6  ;;  %v2772_v37 = vmov (%p314_p0), 1  }
  0xc9   : > { %1412 = vmatmul.msk.f32.gmra.mxu1 %vm324_vm15, %v2092_v42  ;;  %551 = vmatpush.msrb.mxu3 %v2724_v6  ;;  %v1887_v42 = vmov (%p314_p0), 5  }
  0xca   : > { %1439 = vmatpush.msk.msra.mxu1 %vm235_vm0, %v1853_v23  ;;  %714 = vmatpush.msrb.mxu2 %v2724_v6 }
  0xcb   : > { %874 = vmatpush.msra.mxu3 %v2721_v9  ;;  %1000 = vmatpush.msra.mxu0 %v2726_v4 }
  0xcc   : > { %841 = vmatpush.msra.mxu1 %v1857_v24  ;;  %1100 = vmatpush.msra.mxu2 %v2727_v13 }
  0xcd   : > { %875 = vmatpush.msra.mxu3 %v2722_v8  ;;  %1001 = vmatpush.msra.mxu0 %v2728_v3 }
  0xce   : > { %1431 = vmatmul.msk.f32.gmra.mxu0 %vm324_vm15, %v2118_v55  ;;  %842 = vmatpush.msra.mxu1 %v1861_v25 }
  0xcf   : > { %876 = vmatpush.msra.mxu3 %v2723_v7  ;;  %1002 = vmatpush.msra.mxu0 %v2729_v2 }
  0xd0   : > { %1101 = vmatpush.msra.mxu2 %v2730_v12 }
  0xd1   : > { %877 = vmatpush.msra.mxu3 %v2724_v6 }
  0xd2   : > { %1102 = vmatpush.msra.mxu2 %v2731_v11 }
  0xd4   : > { %1103 = vmatpush.msra.mxu2 %v2732_v10 }
  0xd6   : > { %1432 = vmatmul.msk.f32.gmra.mxu0 %vm324_vm15, %v2087_v39  ;;  %v1165_v39 = vld [vmem:[%s2680_s3 + $0x8] sm:$0x3] (%p314_p0) }
 0x13b   : > { %v354_v26 = vpop.f32.mrf.mxu0 }
 0x13c   : > { %1413 = vmatmul.msk.f32.vlgmr.msrb.gmra.mxu1 %vm363_vm1, %v354_v26 }
 0x13e   : > { %v2209_v30 = vpop.f32.mrf.mxu1 }
 0x141   : > { %v2211_v31 = vpop.f32.mrf.mxu2 }
 0x142   : > { %1423 = vmatmul.msk.f32.vlgmr.msrb.gmra.mxu3 %vm363_vm1, %v2211_v31  ;;  %v634_v54 = vadd.f32 %v2211_v31, %v354_v26 }
 0x143   : > { %v2215_v33 = vpop.f32.mrf.mxu0  ;;  %v521_v36 = vpop.f32.mrf.mxu3 }
 0x144   : > { %1414 = vmatmul.msk.f32.gmra.mxu1 %vm363_vm1, %v2209_v30  ;;  %1433 = vmatmul.msk.f32.vlgmr.msrb.gmra.mxu2 %vm363_vm1, %v2215_v33  ;;  %v797_v62 = vadd.f32 %v2215_v33, %v634_v54  ;;  %v635_v23 = vadd.f32 %v521_v36, %v2209_v30 }
 0x146   : > { %v2221_v38 = vpop.f32.mrf.mxu1 }
 0x14a   : > { %1424 = vmatmul.msk.f32.gmra.mxu3 %vm363_vm1, %v521_v36 }
 0x14b   : > { %v684_v40 = vpop.f32.mrf.mxu0  ;;  %v524_v41 = vpop.f32.mrf.mxu3 }
 0x14c   : > { %1415 = vmatmul.msk.f32.gmra.mxu1 %vm363_vm1, %v2221_v38  ;;  %1434 = vmatmul.msk.f32.gmra.mxu2 %vm363_vm1, %v684_v40  ;;  %v798_v24 = vadd.f32 %v684_v40, %v635_v23 }
 0x152   : > { %1425 = vmatmul.msk.f32.gmra.mxu3 %vm363_vm1, %v524_v41 }
 0x153   : > { %v687_v44 = vpop.f32.mrf.mxu0 }
 0x154   : > { %1440 = vmatmul.msk.f32.vlgmr.msra.gmra.mxu1 %vm324_vm15, %v2733_v18  ;;  %1435 = vmatmul.msk.f32.gmra.mxu2 %vm363_vm1, %v687_v44 }
 0x15c   : > { %1441 = vmatmul.msk.f32.gmra.mxu1 %vm324_vm15, %v2099_v45 }
 0x164   : > { %1442 = vmatmul.msk.f32.gmra.mxu1 %vm324_vm15, %v2734_v17 }
 0x1b9   : > { %v390_v46 = vpop.f32.mrf.mxu1 }
 0x1ba   : > { %402 = vrot.lane.b32.xlu0 %v390_v46, %s1883_s11 }
 0x1c1   : > { %v393_v47 = vpop.f32.mrf.mxu1 }
 0x1c2   : > { %404 = vrot.lane.b32.xlu2 %v393_v47, %s1883_s11  ;;  %v636_v47 = vadd.f32 %v524_v41, %v2221_v38 }
 0x1c5   : > { %v553_v50 = vpop.f32.mrf.mxu3 }
 0x1c6   : > { %565 = vrot.lane.b32.xlu0 %v553_v50, %s1883_s11  ;;  %v799_v50 = vadd.f32 %v687_v44, %v636_v47 }
 0x1c7   : > { %v716_v51 = vpop.f32.mrf.mxu2 }
 0x1c8   : > { %728 = vrot.lane.b32.xlu1 %v716_v51, %s1883_s11 }
 0x1c9   : > { %v396_v52 = vpop.f32.mrf.mxu1 }
 0x1cd   : > { %v556_v56 = vpop.f32.mrf.mxu3 }
 0x1ce   : > { %567 = vrot.lane.b32.xlu2 %v556_v56, %s1883_s11 }
 0x1cf   : > { %v719_v59 = vpop.f32.mrf.mxu2 }
 0x1d0   : > { %730 = vrot.lane.b32.xlu0 %v719_v59, %s1883_s11 }
 0x1d1   : > { %v844_v63 = vpop.f32.mrf.mxu1 }
 0x1d2   : > { %v2243_v14 = vadd.f32 %v844_v63, %v797_v62  ;;  %1443 = vmatmul.msk.f32.vlgmr.msra.gmra.mxu3 %vm363_vm1, %v844_v63 }
 0x1d4   : > { %1449 = vmatmul.msk.f32.vlgmr.msra.gmra.mxu0 %vm363_vm1, %v2243_v14 }
 0x1d5   : > { %v559_v19 = vpop.f32.mrf.mxu3 }
 0x1d6   : > { %406 = vrot.lane.b32.xlu2 %v396_v52, %s1883_s11 }
 0x1d8   : > { %569 = vrot.lane.b32.xlu0 %v559_v19, %s1883_s11 }
 0x1d9   : > { %v847_v25 = vpop.f32.mrf.mxu1 }
 0x1da   : > { %v2251_v46 = vadd.f32 %v847_v25, %v798_v24  ;;  %1444 = vmatmul.msk.f32.gmra.mxu3 %vm363_vm1, %v847_v25 }
 0x1dc   : > { %1450 = vmatmul.msk.f32.gmra.mxu0 %vm363_vm1, %v2251_v46 }
 0x1e0   : > { %474 = vrot.lane.b32.xlu0 %v354_v26, %s1883_s11  ;;  %v722_v26 = vpop.f32.mrf.mxu2 }
 0x1e1   : > { %v850_v51 = vpop.f32.mrf.mxu1 }
 0x1e2   : > { %v2258_v54 = vadd.f32 %v850_v51, %v799_v50  ;;  %1445 = vmatmul.msk.f32.gmra.mxu3 %vm363_vm1, %v850_v51 }
 0x1e4   : > { %1451 = vmatmul.msk.f32.gmra.mxu0 %vm363_vm1, %v2258_v54 }
 0x1e8   : > { %963 = vrot.lane.b32.xlu0 %v844_v63, %s1883_s11 }
 0x1f0   : > { %802 = vrot.lane.b32.xlu0 %v684_v40, %s1883_s11 }
 0x1f8   : > { %641 = vrot.lane.b32.xlu0 %v524_v41, %s1883_s11 }
 0x21c   : > { %v405_v40 = vpop.permute.xlu2 %404 }
 0x21d   : > { %v412_v62 = vadd.f32 %v405_v40, %v2142_v21 }
 0x21f   : > { %v1417_v63 = vmul.f32 -1.442695, %v412_v62 }
 0x221   : > { %1551 = vpow2.f32 %v1417_v63 }
 0x228   : > { %v568_v41 = vpop.permute.xlu2 %567 }
 0x255   : > { %v879_v52 = vpop.f32.mrf.mxu3 }
 0x256   : > { %891 = vrot.lane.b32.xlu1 %v879_v52, %s1883_s11 }
 0x25d   : > { %v882_v56 = vpop.f32.mrf.mxu3 }
 0x25e   : > { %893 = vrot.lane.b32.xlu1 %v882_v56, %s1883_s11 }
 0x265   : > { %v885_v59 = vpop.f32.mrf.mxu3 }
 0x266   : > { %732 = vrot.lane.b32.xlu1 %v722_v26, %s1883_s11  ;;  %895 = vrot.lane.b32.xlu2 %v885_v59, %s1883_s11 }
 0x26e   : > { %637 = vrot.lane.b32.xlu1 %v2211_v31, %s1883_s11  ;;  %800 = vrot.lane.b32.xlu2 %v2215_v33, %s1883_s11  ;;  %v403_v31 = vpop.permute.xlu0 %402 }
 0x26f   : > { %v411_v33 = vadd.f32 %v403_v31, %v2140_v20  ;;  %v575_v31 = vadd.f32 %v568_v41, %v2142_v21 }
 0x271   : > { %v1427_v63 = vmul.f32 -1.442695, %v575_v31 }
 0x276   : > { %476 = vrot.lane.b32.xlu1 %v2209_v30, %s1883_s11  ;;  %639 = vrot.lane.b32.xlu2 %v521_v36, %s1883_s11  ;;  %v1416_v30 = vmul.f32 -1.442695, %v411_v33  ;;  %v566_v19 = vpop.permute.xlu0 %565  ;;  %v407_v36 = vpop.permute.xlu2 %406 }
 0x277   : > { %v413_v23 = vadd.f32 %v407_v36, %v2144_v22 }
 0x278   : > { %1553 = vpow2.f32 %v1416_v30 }
 0x279   : > { %v1418_v24 = vmul.f32 -1.442695, %v413_v23 }
 0x27b   : > { %1555 = vpow2.f32 %v1418_v24 }
 0x27e   : > { %965 = vrot.lane.b32.xlu1 %v847_v25, %s1883_s11  ;;  %478 = vrot.lane.b32.xlu2 %v2221_v38, %s1883_s11  ;;  %v574_v38 = vadd.f32 %v566_v19, %v2140_v20  ;;  %v1552_v25 = vpop.eup %1551  ;;  %v731_v50 = vpop.permute.xlu0 %730 }
 0x27f   : > { %v1554_v47 = vpop.eup %1553  ;;  %v2287_v56 = vadd.f32 1.0, %v1552_v25  ;;  %v738_v59 = vadd.f32 %v731_v50, %v2142_v21 }
 0x280   : > { %v1426_v52 = vmul.f32 -1.442695, %v574_v38  ;;  %v2289_v26 = vadd.f32 1.0, %v1554_v47 }
 0x281   : > { %v1437_v62 = vmul.f32 -1.442695, %v738_v59  ;;  %v1556_v33 = vpop.eup %1555  ;;  %v450_v0 = vand.u32 2147483647, %v2287_v56  ;;  %vm446_vm4 = vweird.f32 %v2287_v56 }
 0x282   : > { %1557 = vpow2.f32 %v1426_v52  ;;  %v2295_v36 = vadd.f32 1.0, %v1556_v33  ;;  %vm431_vm5 = vweird.f32 %v2289_v26 }
 0x283   : > { %1559 = vrcp.f32 %v2287_v56  ;;  %vm451_vm8 = vcmp.eq.f32.partialorder %v450_v0, 8.507059e+37 }
 0x284   : > { %1561 = vrcp.f32 %v2289_v26 }
 0x286   : > { %804 = vrot.lane.b32.xlu1 %v687_v44, %s1883_s11  ;;  %967 = vrot.lane.b32.xlu2 %v850_v51, %s1883_s11  ;;  %v729_v44 = vpop.permute.xlu1 %728  ;;  %v570_v30 = vpop.permute.xlu0 %569 }
 0x287   : > { %v737_v51 = vadd.f32 %v729_v44, %v2140_v20  ;;  %v576_v23 = vadd.f32 %v570_v30, %v2144_v22 }
 0x288   : > { %v1558_v19 = vpop.eup %1557 }
 0x289   : > { %v1436_v40 = vmul.f32 -1.442695, %v737_v51  ;;  %v2298_v38 = vpop.eup %1559  ;;  %v2302_v41 = vadd.f32 1.0, %v1558_v19  ;;  %v1428_v25 = vmul.f32 -1.442695, %v576_v23 }
 0x28a   : > { %v2300_v44 = vpop.eup %1561  ;;  %v442_v52 = vmul.f32 %v2298_v38, %v2287_v56  ;;  %vm447_vm2 = vweird.f32 %v2298_v38 }
 0x28b   : > { %1563 = vpow2.f32 %v1436_v40  ;;  %v427_v50 = vmul.f32 %v2300_v44, %v2289_v26  ;;  %vm432_vm3 = vweird.f32 %v2300_v44  ;;  %vm2349_vm6 = vmor %vm446_vm4, %vm447_vm2  ;;  %vm594_vm11 = vweird.f32 %v2302_v41 }
 0x28c   : > { %1565 = vpow2.f32 %v1437_v62  ;;  %v443_v30 = vsub.f32 1.0, %v442_v52  ;;  %vm2354_vm7 = vmor %vm431_vm5, %vm432_vm3 }
 0x28d   : > { %1567 = vpow2.f32 %v1427_v63  ;;  %v428_v33 = vsub.f32 1.0, %v427_v50 }
 0x28e   : > { %1569 = vrcp.f32 %v2295_v36  ;;  %v444_v29 = vmul.f32 %v2298_v38, %v443_v30  ;;  %v475_v0 = vpop.permute.xlu0 %474 }
 0x28f   : > { %1571 = vrcp.f32 %v2302_v41  ;;  %v429_v50 = vmul.f32 %v2300_v44, %v428_v33 }
 0x290   : > { %1573 = vpow2.f32 %v1428_v25 }
 0x291   : > { %v1564_v24 = vpop.eup %1563  ;;  %v430_v33 = vadd.f32 %v2300_v44, %v429_v50 }
 0x292   : > { %v1566_v47 = vpop.eup %1565  ;;  %v2307_v51 = vadd.f32 1.0, %v1564_v24 }
 0x293   : > { %v1568_v59 = vpop.eup %1567  ;;  %v2312_v40 = vadd.f32 1.0, %v1566_v47 }
 0x294   : > { %v2314_v62 = vpop.eup %1569  ;;  %1575 = vrcp.f32 %v2307_v51  ;;  %v2318_v19 = vadd.f32 1.0, %v1568_v59  ;;  %vm757_vm13 = vweird.f32 %v2307_v51 }
 0x295   : > { %v2320_v24 = vpop.eup %1571  ;;  %1577 = vrcp.f32 %v2312_v40  ;;  %v457_v47 = vmul.f32 %v2314_v62, %v2295_v36  ;;  %v778_v10 = vand.u32 2147483648, %v2312_v40  ;;  %vm772_vm10 = vweird.f32 %v2312_v40 }
 0x296   : > { %v1574_v34 = vpop.eup %1573  ;;  %1579 = vrcp.f32 %v2318_v19  ;;  %v590_v59 = vmul.f32 %v2320_v24, %v2302_v41  ;;  %vm595_vm12 = vweird.f32 %v2320_v24 }
 0x297   : > { %v458_v28 = vsub.f32 1.0, %v457_v47  ;;  %v435_v47 = vand.u32 2147483647, %v2289_v26  ;;  %vm2407_vm2 = vmor %vm594_vm11, %vm595_vm12  ;;  %vm609_vm11 = vweird.f32 %v2318_v19 }
 0x299   : > { %vm436_vm9 = vcmp.eq.f32.partialorder %v435_v47, 8.507059e+37  ;;  %v600_v47 = vand.u32 2147483648, %v2302_v41 }
 0x29a   : > { %v2328_v52 = vpop.eup %1575 }
 0x29b   : > { %v2340_v30 = vpop.eup %1577  ;;  %v753_v2 = vmul.f32 %v2328_v52, %v2307_v51  ;;  %vm758_vm14 = vweird.f32 %v2328_v52  ;;  %v601_v17 = vor.u32 1.1754944e-38, %v600_v47 }
 0x29c   : > { %v2360_v4 = vpop.eup %1579  ;;  %vm773_vm3 = vweird.f32 %v2340_v30  ;;  %vm2419_vm4 = vmor %vm757_vm13, %vm758_vm14  ;;  %vm461_vm13 = vweird.f32 %v2295_v36 }
 0x29d   : > { %v754_v8 = vsub.f32 1.0, %v753_v2  ;;  %v605_v2 = vmul.f32 %v2360_v4, %v2318_v19  ;;  %vm610_vm12 = vweird.f32 %v2360_v4 }
 0x2c0   : > { %v896_v31 = vpop.permute.xlu2 %895 }
 0x2c1   : > { %v902_v63 = vadd.f32 %v896_v31, %v2144_v22 }
 0x2c3   : > { %v1448_v1 = vmul.f32 -1.442695, %v902_v63  ;;  %v445_v63 = vadd.f32 %v2298_v38, %v444_v29 }
 0x2c5   : > { %v449_v5 = vsel %vm2349_vm6, %v2298_v38, %v445_v63  ;;  %vm2440_vm6 = vmor %vm772_vm10, %vm773_vm3 }
 0x2c8   : > { %v892_v23 = vpop.permute.xlu1 %891 }
 0x2c9   : > { %v900_v25 = vadd.f32 %v892_v23, %v2140_v20  ;;  %v2334_v23 = vadd.f32 1.0, %v1574_v34  ;;  %v452_v34 = vand.u32 2147483648, %v2287_v56  ;;  %v459_v56 = vmul.f32 %v2314_v62, %v458_v28  ;;  %v1277_v20 = vld [vmem:[#allocation11 + $0x10] sm:$0xff] (%p314_p0) }
 0x2cb   : > { %v1446_v31 = vmul.f32 -1.442695, %v900_v25  ;;  %v437_v25 = vand.u32 2147483648, %v2289_v26  ;;  %v434_v26 = vsel %vm2354_vm7, %v2300_v44, %v430_v33  ;;  %v453_v9 = vor.u32 1.1754944e-38, %v452_v34 }
 0x2cc   : > { %v2375_v29 = vadd.f32 %v2314_v62, %v459_v56  ;;  %vm624_vm10 = vweird.f32 %v2334_v23 }
 0x2cd   : > { %1581 = vpow2.f32 %v1446_v31  ;;  %v591_v31 = vsub.f32 1.0, %v590_v59  ;;  %v768_v59 = vmul.f32 %v2340_v30, %v2312_v40  ;;  %v438_v7 = vor.u32 1.1754944e-38, %v437_v25 }
 0x2ce   : > { %1583 = vpow2.f32 %v1448_v1  ;;  %v2377_v38 = vsel %vm451_vm8, %v453_v9, %v449_v5  ;;  %v776_v5 = vand.u32 2147483647, %v2312_v40  ;;  %v2391_v9 = vor.u32 1.1754944e-38, %v778_v10  ;;  %v964_v40 = vpop.permute.xlu0 %963 }
 0x2cf   : > { %1585 = vrcp.f32 %v2334_v23  ;;  %v592_v44 = vmul.f32 %v2320_v24, %v591_v31  ;;  %v439_v33 = vsel %vm436_vm9, %v438_v7, %v434_v26  ;;  %v769_v63 = vsub.f32 1.0, %v768_v59  ;;  %v801_v26 = vpop.permute.xlu2 %800 }
 0x2d0   : > { %v894_v50 = vpop.permute.xlu1 %893  ;;  %v755_v7 = vmul.f32 %v2328_v52, %v754_v8  ;;  %v598_v8 = vand.u32 2147483647, %v2302_v41  ;;  %v763_v10 = vand.u32 2147483648, %v2307_v51  ;;  %v606_v59 = vsub.f32 1.0, %v605_v2 }
 0x2d1   : > { %v901_v3 = vadd.f32 %v894_v50, %v2142_v21  ;;  %v593_v34 = vadd.f32 %v2320_v24, %v592_v44  ;;  %v770_v1 = vmul.f32 %v2340_v30, %v769_v63  ;;  %v761_v63 = vand.u32 2147483647, %v2307_v51 }
 0x2d2   : > { %v756_v44 = vadd.f32 %v2328_v52, %v755_v7  ;;  %v483_v13 = vmul.f32 %v475_v0, %v439_v33  ;;  %vm2429_vm5 = vcmp.eq.f32.partialorder %v598_v8, 8.507059e+37  ;;  %vm2444_vm7 = vcmp.eq.f32.partialorder %v776_v5, 8.507059e+37 }
 0x2d3   : > { %v1582_v6 = vpop.eup %1581  ;;  %v1447_v50 = vmul.f32 -1.442695, %v901_v3  ;;  %v597_v33 = vsel %vm2407_vm2, %v2320_v24, %v593_v34  ;;  %v2434_v51 = vadd.f32 %v2340_v30, %v770_v1  ;;  %vm2451_vm8 = vcmp.eq.f32.partialorder %v761_v63, 8.507059e+37  ;;  %vm2478_vm2 = vmor %vm609_vm11, %vm610_vm12 }
 0x2d4   : > { %v1584_v28 = vpop.eup %1583  ;;  %v2371_v11 = vadd.f32 1.0, %v1582_v6  ;;  %v760_v1 = vsel %vm2419_vm4, %v2328_v52, %v756_v44  ;;  %vm462_vm9 = vweird.f32 %v2314_v62  ;;  %v602_v5 = vsel %vm2429_vm5, %v601_v17, %v597_v33 }
 0x2d5   : > { %1587 = vpow2.f32 %v1447_v50  ;;  %v2383_v3 = vpop.eup %1585  ;;  %v2385_v6 = vadd.f32 1.0, %v1584_v28  ;;  %vm2518_vm12 = vmor %vm461_vm13, %vm462_vm9 }
 0x2d6   : > { %1589 = vrcp.f32 %v2371_v11  ;;  %v620_v56 = vmul.f32 %v2383_v3, %v2334_v23  ;;  %v924_v63 = vand.u32 2147483647, %v2371_v11  ;;  %vm920_vm3 = vweird.f32 %v2371_v11 }
 0x2d7   : > { %1591 = vrcp.f32 %v2385_v6 }
 0x2d8   : > { %v733_v25 = vpop.permute.xlu1 %732  ;;  %v621_v34 = vsub.f32 1.0, %v620_v56  ;;  %vm925_vm5 = vcmp.eq.f32.partialorder %v924_v63, 8.507059e+37  ;;  %v630_v63 = vand.u32 2147483648, %v2334_v23 }
 0x2d9   : > { %v739_v31 = vadd.f32 %v733_v25, %v2144_v22 }
 0x2db   : > { %v1588_v28 = vpop.eup %1587  ;;  %v1438_v25 = vmul.f32 -1.442695, %v739_v31  ;;  %v764_v31 = vor.u32 1.1754944e-38, %v763_v10 }
 0x2dc   : > { %v1590_v12 = vpop.eup %1589  ;;  %v2423_v2 = vadd.f32 1.0, %v1588_v28  ;;  %v607_v28 = vmul.f32 %v2360_v4, %v606_v59  ;;  %v926_v59 = vand.u32 2147483648, %v2371_v11 }
 0x2dd   : > { %v916_v7 = vmul.f32 %v1590_v12, %v2371_v11  ;;  %1593 = vpow2.f32 %v1438_v25  ;;  %v2462_v52 = vpop.eup %1591  ;;  %vm921_vm14 = vweird.f32 %v1590_v12  ;;  %v775_v25 = vsel %vm2440_vm6, %v2340_v30, %v2434_v51 }
 0x2de   : > { %1595 = vrcp.f32 %v2423_v2  ;;  %v765_v17 = vsel %vm2451_vm8, %v764_v31, %v760_v1  ;;  %v608_v41 = vadd.f32 %v2360_v4, %v607_v28  ;;  %v622_v31 = vmul.f32 %v2383_v3, %v621_v34  ;;  %v640_v28 = vpop.permute.xlu2 %639  ;;  %vm922_vm4 = vmor %vm920_vm3, %vm921_vm14 }
 0x2df   : > { %v917_v8 = vsub.f32 1.0, %v916_v7  ;;  %v615_v7 = vand.u32 2147483648, %v2318_v19  ;;  %v946_v10 = vmul.f32 %v2462_v52, %v2385_v6  ;;  %vm625_vm8 = vweird.f32 %v2383_v3 }
 0x2e0   : > { %v638_v56 = vpop.permute.xlu1 %637  ;;  %v612_v11 = vsel %vm2478_vm2, %v2360_v4, %v608_v41  ;;  %v623_v0 = vadd.f32 %v2383_v3, %v622_v31  ;;  %vm935_vm9 = vweird.f32 %v2423_v2  ;;  %vm950_vm14 = vweird.f32 %v2385_v6 }
 0x2e1   : > { %v646_v50 = vmul.f32 %v638_v56, %v602_v5  ;;  %v918_v44 = vmul.f32 %v1590_v12, %v917_v8  ;;  %v613_v8 = vand.u32 2147483647, %v2318_v19  ;;  %v927_v5 = vor.u32 1.1754944e-38, %v926_v59 }
 0x2e2   : > { %v809_v56 = vmul.f32 %v801_v26, %v765_v17  ;;  %v616_v19 = vor.u32 1.1754944e-38, %v615_v7  ;;  %v947_v17 = vsub.f32 1.0, %v946_v10  ;;  %v803_v7 = vpop.permute.xlu0 %802  ;;  %v465_v10 = vand.u32 2147483647, %v2295_v36 }
 0x2e3   : > { %v1594_v33 = vpop.eup %1593  ;;  %v649_v47 = vadd.f32 %v646_v50, %v483_v13  ;;  %v919_v30 = vadd.f32 %v1590_v12, %v918_v44  ;;  %vm2498_vm6 = vcmp.eq.f32.partialorder %v613_v8, 8.507059e+37  ;;  %vm951_vm2 = vweird.f32 %v2462_v52 }
 0x2e4   : > { %v2484_v51 = vpop.eup %1595  ;;  %v2487_v1 = vadd.f32 1.0, %v1594_v33  ;;  %v617_v8 = vsel %vm2498_vm6, %v616_v19, %v612_v11  ;;  %v631_v19 = vor.u32 1.1754944e-38, %v630_v63  ;;  %vm2566_vm6 = vmor %vm950_vm14, %vm951_vm2 }
 0x2e5   : > { %v923_v18 = vsel %vm922_vm4, %v1590_v12, %v919_v30  ;;  %v931_v13 = vmul.f32 %v2484_v51, %v2423_v2  ;;  %v812_v44 = vadd.f32 %v809_v56, %v649_v47  ;;  %v628_v12 = vand.u32 2147483647, %v2334_v23 }
 0x2e6   : > { %1597 = vrcp.f32 %v2487_v1  ;;  %v928_v34 = vsel %vm925_vm5, %v927_v5, %v923_v18  ;;  %vm936_vm11 = vweird.f32 %v2484_v51  ;;  %v941_v47 = vand.u32 2147483648, %v2423_v2 }
 0x2e7   : > { %v972_v59 = vmul.f32 %v964_v40, %v928_v34  ;;  %v932_v26 = vsub.f32 1.0, %v931_v13  ;;  %v780_v40 = vsel %vm2444_vm7, %v2391_v9, %v775_v25  ;;  %vm2527_vm7 = vmor %vm624_vm10, %vm625_vm8  ;;  %v647_v24 = vmul.f32 %v640_v28, %v617_v8  ;;  %v479_v34 = vpop.permute.xlu2 %478 }
 0x2e8   : > { %v477_v33 = vpop.permute.xlu1 %476  ;;  %v939_v30 = vand.u32 2147483647, %v2423_v2  ;;  %v464_v23 = vsel %vm2518_vm12, %v2314_v62, %v2375_v29  ;;  %v467_v5 = vand.u32 2147483648, %v2295_v36  ;;  %v948_v28 = vmul.f32 %v2462_v52, %v947_v17  ;;  %vm2544_vm10 = vmor %vm935_vm9, %vm936_vm11 }
 0x2e9   : > { %v484_v4 = vmul.f32 %v477_v33, %v2377_v38  ;;  %v975_v41 = vadd.f32 %v972_v59, %v812_v44  ;;  %v933_v18 = vmul.f32 %v2484_v51, %v932_v26  ;;  %vm2548_vm13 = vcmp.eq.f32.partialorder %v628_v12, 8.507059e+37 }
 0x2ea   : > { %v810_v36 = vmul.f32 %v803_v7, %v780_v40  ;;  %v627_v11 = vsel %vm2527_vm7, %v2383_v3, %v623_v0  ;;  %v942_v50 = vor.u32 1.1754944e-38, %v941_v47  ;;  %vm940_vm3 = vcmp.eq.f32.partialorder %v939_v30, 8.507059e+37  ;;  %v642_v38 = vpop.permute.xlu0 %641 }
 0x2eb   : > { %1076 = vrot.lane.b32.xlu0 %v975_v41, %s1884_s12  ;;  %v934_v25 = vadd.f32 %v2484_v51, %v933_v18  ;;  %v650_v13 = vadd.f32 %v647_v24, %v484_v4  ;;  %v949_v59 = vadd.f32 %v2462_v52, %v948_v28  ;;  %v956_v26 = vand.u32 2147483648, %v2385_v6 }
 0x2ec   : > { %v1598_v31 = vpop.eup %1597  ;;  %vm466_vm5 = vcmp.eq.f32.partialorder %v465_v10, 8.507059e+37  ;;  %v468_v63 = vor.u32 1.1754944e-38, %v467_v5  ;;  %v793_v18 = vand.u32 2147483648, %v2487_v1  ;;  %vm787_vm8 = vweird.f32 %v2487_v1 }
 0x2ed   : > { %v938_v62 = vsel %vm2544_vm10, %v2484_v51, %v934_v25  ;;  %v783_v29 = vmul.f32 %v1598_v31, %v2487_v1  ;;  %v954_v51 = vand.u32 2147483647, %v2385_v6  ;;  %v813_v33 = vadd.f32 %v810_v36, %v650_v13 }
 0x2ee   : > { %v943_v12 = vsel %vm940_vm3, %v942_v50, %v938_v62  ;;  %vm788_vm4 = vweird.f32 %v1598_v31  ;;  %v791_v0 = vand.u32 2147483647, %v2487_v1  ;;  %v632_v8 = vsel %vm2548_vm13, %v631_v19, %v627_v11 }
 0x2ef   : > { %v784_v44 = vsub.f32 1.0, %v783_v29  ;;  %v469_v47 = vsel %vm466_vm5, %v468_v63, %v464_v23  ;;  %v957_v9 = vor.u32 1.1754944e-38, %v956_v26  ;;  %vm789_vm11 = vmor %vm787_vm8, %vm788_vm4  ;;  %v953_v24 = vsel %vm2566_vm6, %v2462_v52, %v949_v59  ;;  %v968_v5 = vpop.permute.xlu2 %967 }
 0x2f0   : > { %v966_v17 = vpop.permute.xlu1 %965  ;;  %v485_v6 = vmul.f32 %v479_v34, %v469_v47  ;;  %vm955_vm12 = vcmp.eq.f32.partialorder %v954_v51, 8.507059e+37  ;;  %v794_v30 = vor.u32 1.1754944e-38, %v793_v18  ;;  %v648_v10 = vmul.f32 %v642_v38, %v632_v8 }
 0x2f1   : > { %v973_v4 = vmul.f32 %v966_v17, %v943_v12  ;;  %v785_v3 = vmul.f32 %v1598_v31, %v784_v44  ;;  %vm792_vm7 = vcmp.eq.f32.partialorder %v791_v0, 8.507059e+37  ;;  %v958_v1 = vsel %vm955_vm12, %v957_v9, %v953_v24 }
 0x2f2   : > { %v651_v2 = vadd.f32 %v648_v10, %v485_v6  ;;  %v974_v13 = vmul.f32 %v968_v5, %v958_v1 }
 0x2f3   : > { %v976_v40 = vadd.f32 %v973_v4, %v813_v33  ;;  %v786_v7 = vadd.f32 %v1598_v31, %v785_v3  ;;  %v1004_v4 = vpop.f32.mrf.mxu0 }
 0x2f4   : > { %v1013_v38 = vadd.f32 %v1004_v4, %v2120_v57 }
 0x2f5   : > { %1078 = vrot.lane.b32.xlu1 %v976_v40, %s1884_s12  ;;  %v790_v25 = vsel %vm789_vm11, %v1598_v31, %v786_v7 }
 0x2f6   : > { %v795_v28 = vsel %vm792_vm7, %v794_v30, %v790_v25  ;;  %v1452_v9 = vmul.f32 -1.442695, %v1013_v38 }
 0x2f8   : > { %v805_v56 = vpop.permute.xlu1 %804 }
 0x2f9   : > { %v811_v23 = vmul.f32 %v805_v56, %v795_v28 }
 0x2fb   : > { %v814_v62 = vadd.f32 %v811_v23, %v651_v2  ;;  %v1007_v63 = vpop.f32.mrf.mxu0 }
 0x2fc   : > { %v1014_v25 = vadd.f32 %v1007_v63, %v2124_v60  ;;  %v1274_v60 = vld [vmem:[#allocation10 + $0x8] sm:$0xff] (%p314_p0) }
 0x2fd   : > { %v977_v29 = vadd.f32 %v974_v13, %v814_v62 }
 0x2fe   : > { %v1453_v5 = vmul.f32 -1.442695, %v1014_v25 }
 0x2ff   : > { %1080 = vrot.lane.b32.xlu2 %v977_v29, %s1884_s12 }
 0x303   : > { %v1010_v41 = vpop.f32.mrf.mxu0 }
 0x304   : > { %v1015_v18 = vadd.f32 %v1010_v41, %v2129_v15  ;;  %v1273_v15 = vld [vmem:[#allocation10] sm:$0xff] (%p314_p0) }
 0x306   : > { %v1454_v40 = vmul.f32 -1.442695, %v1015_v18 }
 0x359   : > { %v1081_v31 = vpop.permute.xlu2 %1080 }
 0x35d   : > { %v1077_v36 = vpop.permute.xlu0 %1076 }
 0x35e   : > { %1455 = vmatmul.msk.f32.vlgmr.msra.gmra.mxu2 %vm363_vm1, %v1077_v36 }
 0x35f   :  { %1329 = vmatpush.msra.mxu2 (%p314_p0), %v1274_v60 }
 0x361   :  { %1330 = vmatpush.msra.mxu2 (%p314_p0), %v1273_v15 }
 0x367   : > { %v1079_v52 = vpop.permute.xlu1 %1078 }
 0x368   : > { %1456 = vmatmul.msk.f32.gmra.mxu2 %vm363_vm1, %v1079_v52 }
 0x370   : > { %1457 = vmatmul.msk.f32.gmra.mxu2 %vm363_vm1, %v1081_v31 }
 0x3e1   : > { %v1105_v11 = vpop.f32.mrf.mxu2 }
 0x3e2   : > { %1117 = vrot.lane.b32.xlu0 %v1105_v11, %s1885_s8 }
 0x3eb   : > { %v1108_v19 = vpop.f32.mrf.mxu2 }
 0x3ec   : > { %1119 = vrot.lane.b32.xlu1 %v1108_v19, %s1885_s8 }
 0x3f3   : > { %v1111_v34 = vpop.f32.mrf.mxu2 }
 0x3f4   : > { %1121 = vrot.lane.b32.xlu2 %v1111_v34, %s1885_s8 }
 0x44e   : > { %v1122_v50 = vpop.permute.xlu2 %1121 }
 0x44f   : > { %v1128_v44 = vadd.f32 %v1122_v50, %v2131_v16  ;;  %v1271_v16 = vld [vmem:[%s2679_s2] sm:$0xff] (%p314_p0) }
 0x451   : > { %1599 = vtanh.f32 %v1128_v44 }
 0x454   : > { %v1118_v59 = vpop.permute.xlu0 %1117 }
 0x455   : > { %v1126_v51 = vadd.f32 %v1118_v59, %v2122_v58 }
 0x457   : > { %v1600_v26 = vpop.eup %1599  ;;  %1601 = vtanh.f32 %v1126_v51 }
 0x458   : > { %1145 = vrot.lane.b32.xlu2 %v1600_v26, %s1885_s8 }
 0x45d   : > { %v1602_v12 = vpop.eup %1601 }
 0x45e   : > { %1141 = vrot.lane.b32.xlu0 %v1602_v12, %s1885_s8  ;;  %v1120_v17 = vpop.permute.xlu1 %1119 }
 0x45f   : > { %v1127_v33 = vadd.f32 %v1120_v17, %v2126_v61  ;;  %v1278_v61 = vld [vmem:[#allocation11 + $0x18] sm:$0xff] (%p314_p0) }
 0x460   :  { %1297 = vmatpush.msra.mxu1 (%p314_p0), %v1278_v61  ;;  %1479 = vmatpush.msra.mxu3 (%p314_p0), %v1278_v61 }
 0x461   : > { %1603 = vtanh.f32 %v1127_v33 }
 0x462   : > { %1605 = vpow2.f32 %v1454_v40  ;;  %1298 = vmatpush.msra.mxu1 (%p314_p0), %v1277_v20  ;;  %1480 = vmatpush.msra.mxu3 (%p314_p0), %v1277_v20 }
 0x467   : > { %v1604_v3 = vpop.eup %1603 }
 0x468   : > { %1143 = vrot.lane.b32.xlu1 %v1604_v3, %s1885_s8  ;;  %v1606_v7 = vpop.eup %1605 }
 0x469   : > { %v1027_v0 = vadd.f32 1.0, %v1606_v7 }
 0x46b   : > { %1607 = vrcp.f32 %v1027_v0  ;;  %v1069_v10 = vand.u32 2147483648, %v1027_v0  ;;  %vm1063_vm10 = vweird.f32 %v1027_v0  ;;  %v1067_v28 = vand.u32 2147483647, %v1027_v0 }
 0x46c   : > { %1609 = vpow2.f32 %v1452_v9 }
 0x46d   : > { %v1070_v23 = vor.u32 1.1754944e-38, %v1069_v10  ;;  %1611 = vpow2.f32 %v1453_v5  ;;  %vm1068_vm14 = vcmp.eq.f32.partialorder %v1067_v28, 8.507059e+37 }
 0x471   : > { %v1608_v8 = vpop.eup %1607 }
 0x472   : > { %v1059_v47 = vmul.f32 %v1608_v8, %v1027_v0  ;;  %vm1064_vm9 = vweird.f32 %v1608_v8  ;;  %v1610_v1 = vpop.eup %1609 }
 0x473   : > { %vm1065_vm13 = vmor %vm1063_vm10, %vm1064_vm9  ;;  %v1025_v2 = vadd.f32 1.0, %v1610_v1  ;;  %v1612_v29 = vpop.eup %1611  ;;  %vm1308_vm10 = vcmask (%p314_p0), 130048  }
 0x474   : > { %v1060_v6 = vsub.f32 1.0, %v1059_v47  ;;  %v1026_v19 = vadd.f32 1.0, %v1612_v29  ;;  %1463 = vmatmul.msk.f32.vlgmr.msra.gmra.mxu2 (%p314_p0), %vm1308_vm10, %v1271_v16 }
 0x475   : > { %1613 = vrcp.f32 %v1025_v2  ;;  %v1039_v17 = vand.u32 2147483648, %v1025_v2  ;;  %vm1033_vm3 = vweird.f32 %v1025_v2  ;;  %v1037_v33 = vand.u32 2147483647, %v1025_v2 }
 0x476   : > { %v1061_v24 = vmul.f32 %v1608_v8, %v1060_v6  ;;  %1615 = vrcp.f32 %v1026_v19  ;;  %v1054_v7 = vand.u32 2147483648, %v1026_v19  ;;  %vm1048_vm8 = vweird.f32 %v1026_v19 }
 0x477   : > { %vm1038_vm5 = vcmp.eq.f32.partialorder %v1037_v33, 8.507059e+37  ;;  %v1052_v0 = vand.u32 2147483647, %v1026_v19 }
 0x478   : > { %v1062_v30 = vadd.f32 %v1608_v8, %v1061_v24  ;;  %v1055_v6 = vor.u32 1.1754944e-38, %v1054_v7 }
 0x479   : > { %vm1053_vm12 = vcmp.eq.f32.partialorder %v1052_v0, 8.507059e+37 }
 0x47a   : > { %v1066_v56 = vsel %vm1065_vm13, %v1608_v8, %v1062_v30 }
 0x47b   : > { %v1071_v13 = vsel %vm1068_vm14, %v1070_v23, %v1066_v56  ;;  %v1614_v11 = vpop.eup %1613 }
 0x47c   : > { %v1134_v62 = vsub.f32 1.0, %v1071_v13  ;;  %v1029_v50 = vmul.f32 %v1614_v11, %v1025_v2  ;;  %v1616_v59 = vpop.eup %1615  ;;  %vm1034_vm2 = vweird.f32 %v1614_v11  ;;  %v2770_v2 = vmov (%p314_p0), 0  }
 0x47d   : > { %v1044_v26 = vmul.f32 %v1616_v59, %v1026_v19  ;;  %vm1035_vm4 = vmor %vm1033_vm3, %vm1034_vm2  ;;  %vm1049_vm6 = vweird.f32 %v1616_v59  ;;  %1617 = vset.pattern.permute.xlu0 (%p314_p0), %v2770_v2 }
 0x47e   : > { %v1137_v52 = vmul.f32 %v1134_v62, %v2258_v54  ;;  %v1030_v44 = vsub.f32 1.0, %v1029_v50  ;;  %v1040_v54 = vor.u32 1.1754944e-38, %v1039_v17  ;;  %vm1050_vm11 = vmor %vm1048_vm8, %vm1049_vm6 }
 0x47f   : > { %v1045_v4 = vsub.f32 1.0, %v1044_v26 }
 0x480   : > { %v1031_v51 = vmul.f32 %v1614_v11, %v1030_v44 }
 0x481   : > { %v1046_v63 = vmul.f32 %v1616_v59, %v1045_v4 }
 0x482   : > { %v1032_v12 = vadd.f32 %v1614_v11, %v1031_v51 }
 0x483   : > { %v1047_v40 = vadd.f32 %v1616_v59, %v1046_v63 }
 0x484   : > { %v1036_v3 = vsel %vm1035_vm4, %v1614_v11, %v1032_v12 }
 0x485   : > { %v1041_v41 = vsel %vm1038_vm5, %v1040_v54, %v1036_v3  ;;  %v1051_v9 = vsel %vm1050_vm11, %v1616_v59, %v1047_v40 }
 0x486   : > { %v1132_v18 = vsub.f32 1.0, %v1041_v41  ;;  %v1056_v25 = vsel %vm1053_vm12, %v1055_v6, %v1051_v9  ;;  %vm1349_vm12 = vcmask (%p314_p0), 254976  }
 0x487   : > { %v1133_v10 = vsub.f32 1.0, %v1056_v25 }
 0x488   : > { %v1135_v38 = vmul.f32 %v1132_v18, %v2243_v14  ;;  %v2769_v14 = vmov (%p314_p0), 2  }
 0x489   : > { %v1136_v5 = vmul.f32 %v1133_v10, %v2251_v46  ;;  %1619 = vset.pattern.permute.xlu1 (%p314_p0), %v2769_v14  ;;  %v1164_v46 = vld [vmem:[%s2680_s3] sm:$0xff] (%p314_p0) }
 0x48a   :  { %1191 = vperm.xlu1 (%p314_p0), %1619, %v1164_v46   ;;  %1167 = vperm.xlu0 (%p314_p0), %1617, %v1164_v46  }
 0x492   :  { %1620 = vset.pattern.permute.xlu1 (%p314_p0), %v2771_v35  ;;  %1618 = vset.pattern.permute.xlu0 (%p314_p0), %v2772_v37 }
 0x493   :  { %1203 = vperm.xlu1 (%p314_p0), %1620, %v1164_v46   ;;  %1179 = vperm.xlu0 (%p314_p0), %1618, %v1164_v46  }
 0x49b   :  { %1623 = vset.pattern.permute.xlu1 (%p314_p0), %v2772_v37  ;;  %1625 = vset.pattern.permute.xlu0 (%p314_p0), %v2769_v14 }
 0x49c   :  { %1182 = vperm.xlu1 (%p314_p0), %1623, %v1165_v39   ;;  %1194 = vperm.xlu0 (%p314_p0), %1625, %v1165_v39  }
 0x4a4   :  { %1626 = vset.pattern.permute.xlu1 (%p314_p0), %v2771_v35  ;;  %1629 = vset.pattern.permute.xlu0 (%p314_p0), %v1887_v42 }
 0x4a5   :  { %1206 = vperm.xlu1 (%p314_p0), %1626, %v1165_v39  }
 0x4ad   :  { %1628 = vset.pattern.permute.xlu1 (%p314_p0), %v1887_v42 }
 0x4ae   :  { %1230 = vperm.xlu1 (%p314_p0), %1628, %v1165_v39  }
 0x4b2   : > { %v1146_v36 = vpop.permute.xlu2 %1145 }
 0x4b3   : > { %v1152_v31 = vmul.f32 %v1146_v36, %v1071_v13  ;;  %v1886_v13 = vmov (%p314_p0), 4  }
 0x4b4   :  { %1621 = vset.pattern.permute.xlu2 (%p314_p0), %v1886_v13 }
 0x4b5   : > { %v2590_v23 = vadd.f32 %v1152_v31, %v1137_v52   ;;  %1215 = vperm.xlu2 (%p314_p0), %1621, %v1164_v46  }
 0x4b7   : > { %v2765_v34 = vmov %v2590_v23 }
 0x4b8   : > { %v2766_v23 = vmov %v2765_v34  ;;  %1458 = vmatpush.msk.msra.mxu0 (%p314_p0), %vm235_vm0, %v2765_v34 }
 0x4b9   :  { %v1276_v23 = vld [vmem:[#allocation11 + $0x8] sm:$0xff] (%p314_p0) }
 0x4ba   :  { %1299 = vmatpush.msra.mxu1 (%p314_p0), %v1276_v23  ;;  %1481 = vmatpush.msra.mxu3 (%p314_p0), %v1276_v23 }
 0x4bd   :  { %1622 = vset.pattern.permute.xlu2 (%p314_p0), %v2770_v2 }
 0x4be   :  { %1170 = vperm.xlu2 (%p314_p0), %1622, %v1165_v39  }
 0x4c6   :  { %1624 = vset.pattern.permute.xlu2 (%p314_p0), %v1887_v42 }
 0x4c7   :  { %1227 = vperm.xlu2 (%p314_p0), %1624, %v1164_v46  }
 0x4cf   :  { %1627 = vset.pattern.permute.xlu2 (%p314_p0), %v1886_v13 }
 0x4d0   : > { %v1142_v8 = vpop.permute.xlu0 %1141  ;;  %1218 = vperm.xlu2 (%p314_p0), %1627, %v1165_v39  }
 0x4d1   : > { %v1150_v47 = vmul.f32 %v1142_v8, %v1041_v41 }
 0x4d3   : > { %v1153_v24 = vadd.f32 %v1150_v47, %v1135_v38  ;;  %v1275_v38 = vld [vmem:[#allocation11] sm:$0xff] (%p314_p0) }
 0x4d4   :  { %1300 = vmatpush.msra.mxu1 (%p314_p0), %v1275_v38  ;;  %1482 = vmatpush.msra.mxu3 (%p314_p0), %v1275_v38  ;;  %v1272_v47 = vld [vmem:[%s2679_s2 + $0x8] sm:$0x3] (%p314_p0)  ;;  %s1889_s2 = smov (%p314_p0), [#allocation13]  }
 0x4d5   : > { %v1156_v30 = vmul.f32 %v1153_v24, %v2060_v27   ;;  %1464 = vmatmul.msk.f32.gmra.mxu2 (%p314_p0), %vm1308_vm10, %v1272_v47 }
 0x4d7   :  { %1160 = vst.msk [vmem:[#allocation14] sm:$0xff] (%p314_p0), %vm363_vm1, %v1156_v30 }
 0x4da   : > { %v1144_v1 = vpop.permute.xlu1 %1143 }
 0x4db   : > { %v1151_v28 = vmul.f32 %v1144_v1, %v1056_v25  ;;  %v2768_v25 = vmov %v1156_v30  ;;  %316 = sbr.rel (!%p314_p0) target bundleno = 185 (0xb9), region = 115 }
 0x4dd   : > { %v1154_v56 = vadd.f32 %v1151_v28, %v1136_v5  }
 0x4df   : > { %v2767_v24 = vmov %v1154_v56  ;;  %1161 = vst.msk [vmem:[#allocation14 + $0x8] sm:$0xff] (%p314_p0), %vm363_vm1, %v1154_v56  ;;  %1262 = vmatpush.msra.mxu0 (%p314_p0), %v1154_v56 }
 0x4e0   :  { %v1630_v24 = vld [vmem:[%s2690_s13] ss:$0 sm:$0xff]  ;;  %s1355_s13 = sshll.u32 %s1889_s2, 4  ;;  %s1356_s13 = int_to_ptr.vmem [resolvable:$true] %s1355_s13 }
 0x4e1   :  { %1263 = vmatpush.msra.mxu0 %v1156_v30 }
 0x4fc   :  { %v1192_v45 = vpop.permute.xlu1 %1191  ;;  %v1168_v48 = vpop.permute.xlu0 %1167 }
 0x4fd   :  { %vm1172_vm0 = vcmp.eq.s32.totalorder %v1168_v48, %v2075_v32  ;;  %vm1196_vm7 = vcmp.eq.s32.totalorder %v1192_v45, %v2075_v32 }
 0x4fe   :  { %v1174_v55 = vsel %vm1172_vm0, 1.0, %v2773_v53  ;;  %v1198_v29 = vsel %vm1196_vm7, 1.0, %v2773_v53 }
 0x505   :  { %v1204_v57 = vpop.permute.xlu1 %1203  ;;  %v1180_v58 = vpop.permute.xlu0 %1179 }
 0x506   :  { %vm1184_vm9 = vcmp.eq.s32.totalorder %v1180_v58, %v2075_v32  ;;  %vm1208_vm13 = vcmp.eq.s32.totalorder %v1204_v57, %v2075_v32 }
 0x507   :  { %v1186_v21 = vsel %vm1184_vm9, 1.0, %v2773_v53  ;;  %v1210_v52 = vsel %vm1208_vm13, 1.0, %v2773_v53 }
 0x508   :  { %v1188_v62 = vadd.f32 %v1186_v21, %v1174_v55 }
 0x50a   :  { %v1200_v36 = vadd.f32 %v1198_v29, %v1188_v62 }
 0x50c   :  { %v1212_v31 = vadd.f32 %v1210_v52, %v1200_v36 }
 0x50e   :  { %v1183_v50 = vpop.permute.xlu1 %1182  ;;  %v1195_v51 = vpop.permute.xlu0 %1194 }
 0x50f   :  { %v1216_v43 = vpop.permute.xlu2 %1215  ;;  %vm1185_vm3 = vcmp.eq.s32.totalorder %v1183_v50, %v2075_v32  ;;  %vm1197_vm5 = vcmp.eq.s32.totalorder %v1195_v51, %v2075_v32 }
 0x510   :  { %vm1220_vm14 = vcmp.eq.s32.totalorder %v1216_v43, %v2075_v32  ;;  %v1187_v26 = vsel %vm1185_vm3, 1.0, %v2773_v53  ;;  %v1199_v4 = vsel %vm1197_vm5, 1.0, %v2773_v53 }
 0x511   :  { %v1222_v11 = vsel %vm1220_vm14, 1.0, %v2773_v53 }
 0x512   :  { %v1224_v44 = vadd.f32 %v1222_v11, %v1212_v31 }
 0x517   :  { %v1207_v33 = vpop.permute.xlu1 %1206 }
 0x518   :  { %v1171_v49 = vpop.permute.xlu2 %1170  ;;  %vm1209_vm6 = vcmp.eq.s32.totalorder %v1207_v33, %v2075_v32 }
 0x519   :  { %vm1173_vm4 = vcmp.eq.s32.totalorder %v1171_v49, %v2075_v32  ;;  %v1211_v54 = vsel %vm1209_vm6, 1.0, %v2773_v53 }
 0x51a   :  { %v1175_v12 = vsel %vm1173_vm4, 1.0, %v2773_v53 }
 0x51b   :  { %v1189_v17 = vadd.f32 %v1187_v26, %v1175_v12 }
 0x51d   :  { %v1201_v63 = vadd.f32 %v1199_v4, %v1189_v17 }
 0x51f   :  { %v1213_v41 = vadd.f32 %v1211_v54, %v1201_v63 }
 0x520   :  { %v1231_v40 = vpop.permute.xlu1 %1230 }
 0x521   :  { %v1228_v22 = vpop.permute.xlu2 %1227  ;;  %vm1233_vm11 = vcmp.eq.s32.totalorder %v1231_v40, %v2075_v32 }
 0x522   :  { %vm1232_vm2 = vcmp.eq.s32.totalorder %v1228_v22, %v2075_v32  ;;  %v1235_v0 = vsel %vm1233_vm11, 1.0, %v2773_v53 }
 0x523   :  { %v1234_v19 = vsel %vm1232_vm2, 1.0, %v2773_v53 }
 0x524   :  { %v1236_v59 = vadd.f32 %v1234_v19, %v1224_v44 }
 0x526   :  { %1459 = vmatmul.msk.f32.vlgmr.msra.gmra.mxu0 %vm324_vm15, %v1236_v59 }
 0x52a   :  { %v1219_v3 = vpop.permute.xlu2 %1218 }
 0x52b   :  { %vm1221_vm8 = vcmp.eq.s32.totalorder %v1219_v3, %v2075_v32  ;;  %v1332_v32 = vpop.f32.mrf.mxu2 }
 0x52c   :  { %v1223_v18 = vsel %vm1221_vm8, 1.0, %v2773_v53 }
 0x52d   :  { %v1225_v7 = vadd.f32 %v1223_v18, %v1213_v41 }
 0x52f   :  { %v1237_v8 = vadd.f32 %v1235_v0, %v1225_v7 }
 0x531   :  { %1460 = vmatmul.msk.f32.gmra.mxu0 %vm324_vm15, %v1237_v8  ;;  %vm1162_vm15 = vcmask 257024  }
 0x532   :  { %1163 = vst.msk [vmem:[#allocation14 + $0x10] sm:$0xf] %vm1162_vm15, %v2765_v34 }
 0x533   :  { %1376 = dma.vmem_to_hbm [thread:$0]  %s1369_s23, 384, %s1371_s25, [#allocation15], %s1868_s26, %s1868_s26, %s1869_s27  }
 0x558   :  { %v1335_v28 = vpop.f32.mrf.mxu2 }
 0x5a3   :  { %v1265_v9 = vpop.f32.mrf.mxu0 }
 0x5a4   :  { %1461 = vmatmul.msk.f32.vlgmr.msra.gmra.mxu1 %vm363_vm1, %v1265_v9 }
 0x5ae   :  { %v1268_v6 = vpop.f32.mrf.mxu0 }
 0x5af   :  { %1462 = vmatmul.msk.f32.vlgmr.msra.gmra.mxu3 %vm363_vm1, %v1268_v6 }
 0x621   :  { %v1302_v25 = vpop.f32.mrf.mxu1 }
 0x622   :  { %v1333_v30 = vadd.f32 %v1332_v32, %v1302_v25 }
 0x624   :  { %v1342_v10 = vadd.f32 %v1630_v24, %v1333_v30 }
 0x626   :  { %v1344_v1 = vmax.f32 %v1342_v10, 0.0 }
 0x628   :  { %v1346_v5 = vmul.f32 %v1344_v1, %v2060_v27 }
 0x62a   :  { %1348 = vst.msk [vmem:[#allocation13] sm:$0xff] %vm363_vm1, %v1346_v5 }
 0x632   :  { %v1305_v56 = vpop.f32.mrf.mxu3 }
 0x633   :  { %v1336_v14 = vadd.f32 %v1335_v28, %v1305_v56 }
 0x635   :  { %v1343_v34 = vadd.f32 %v1630_v24, %v1336_v14 }
 0x637   :  { %v1345_v2 = vmax.f32 %v1343_v34, 0.0 }
 0x639   :  { %1350 = vst.msk [vmem:[#allocation13 + $0x8] sm:$0x3] %vm1349_vm12, %v1345_v2 }
 0x63a   :  { %1363 = dma.vmem_to_hbm [thread:$0]  %s1356_s13, 256, %s1358_s29, [#allocation4], %s1868_s26, %s1868_s26, %s1869_s27  }
 0x63b   :  { %1847 = dma.done.wait [#allocation4], 256  }
 0x63c   :  { %1848 = vsyncadd [#allocation4], 4294967040 }
 0x63d   :  { %1849 = dma.done.wait [#allocation15], 384  }
 0x63e   :  { %1850 = vsyncadd [#allocation15], 4294966912 }
 0x63f   :  { %1385 = vsyncpa [#allocation3], 1 }
 0x640   :  { %1386 = vsyncpa [#allocation6], 1 }
 0x641   :  { %1387 = vsyncpa [#allocation9], 1 }
 0x642   :  { %1388 = vsyncpa [#allocation12], 1 }
 0x643   :  { %1389 = vsyncpa [#allocation4], 1 }
 0x644   :  { %1390 = vsyncpa [#allocation15], 1 }

</bundles_post_ra>
